<compile_context>
chip_gen: v5e
topology: v5e:2x2
jax: 0.10.0
libtpu: 0.0.40
codegen_flags: <defaults>
</compile_context>

<pallas_src>
import functools
import math

import jax
import jax.numpy as jnp
from jax import lax
from jax.experimental import pallas as pl
from jax.experimental.pallas import tpu as pltpu

D_MODEL = 32
D_INNER = 64
N_HEAD = 4
SEQ = 8
BATCH = 2
KS = 9
PAD = KS // 2
EPS = 1e-5


def _layernorm(x, gamma, beta):
    mu = jnp.mean(x, axis=-1, keepdims=True)
    var = jnp.mean((x - mu) ** 2, axis=-1, keepdims=True)
    return (x - mu) * lax.rsqrt(var + EPS) * gamma + beta


def fft_block_kernel(x_ref, w_in_ref, b_in_ref, w_out_ref, b_out_ref,
                     g1_ref, bt1_ref, w1_ref, b1_ref, w2_ref, b2_ref,
                     g2_ref, bt2_ref,
                     y_ref, attn_ref,
                     x1_ref, im2col_ref, *, n_head, ks, seq_len):
    BL, D = x_ref.shape                     # (bblk*L, D), batch flattened
    L = seq_len
    bblk = BL // L
    hd = D // n_head
    scale = 1.0 / math.sqrt(hd)
    pad = ks // 2

    # Small shared weights: load once per grid step (hoisted out of all loops).
    w_in = w_in_ref[...]
    b_in = b_in_ref[...]
    w_out = w_out_ref[...]
    b_out = b_out_ref[...]
    g1, bt1 = g1_ref[...], bt1_ref[...]
    w1, b1 = w1_ref[...], b1_ref[...]
    w2, b2 = w2_ref[...], b2_ref[...]
    g2, bt2 = g2_ref[...], bt2_ref[...]

    # ---- QKV projection for the whole block in ONE matmul -------------------
    x_all = x_ref[...]                                                   # (BL, D)
    qkv = jnp.dot(x_all, w_in, preferred_element_type=jnp.float32) + b_in

    # ---- per-batch multi-head self-attention + residual + LayerNorm ---------
    for bi in range(bblk):                  # static unroll: 1 (multi-TC) or B
        base = bi * L
        x = x_all[base:base + L, :]
        q = qkv[base:base + L, 0:D]
        k = qkv[base:base + L, D:2 * D]
        v = qkv[base:base + L, 2 * D:3 * D]

        o_acc = None       # output projection folded into the head loop
        attn_sum = None    # accumulate from first head's p (no zeros init)
        for h in range(n_head):
            qh = q[:, h * hd:(h + 1) * hd] * scale
            kh = k[:, h * hd:(h + 1) * hd]
            vh = v[:, h * hd:(h + 1) * hd]
            scores = lax.dot_general(qh, kh, (((1,), (1,)), ((), ())),
                                     preferred_element_type=jnp.float32)
            scores = scores - jnp.max(scores, axis=-1, keepdims=True)
            p = jnp.exp(scores)
            # exact divide kept on purpose (keeps the 1e-3 check tight)
            p = p / jnp.sum(p, axis=-1, keepdims=True)
            oh = jnp.dot(p, vh, preferred_element_type=jnp.float32)      # (L, hd)
            proj = jnp.dot(oh, w_out[h * hd:(h + 1) * hd, :],
                           preferred_element_type=jnp.float32)           # (L, D)
            o_acc = proj if o_acc is None else o_acc + proj
            attn_sum = p if attn_sum is None else attn_sum + p

        # dropout == identity (inference); residual + LayerNorm
        x1_ref[base:base + L, :] = _layernorm(x + (o_acc + b_out), g1, bt1)
        attn_ref[bi] = attn_sum * (1.0 / n_head)   # average_attn_weights=True

    # ---- position-wise FFN on the WHOLE block --------------------------------
    # k=9 'same' conv as ONE im2col matmul (M = bblk*L, K = ks*D).  The halo
    # zeros come from a single zero fill; the taps are statically-bounded
    # shifted copies out of the x1 scratch (never crossing batch boundaries).
    im2col_ref[...] = jnp.zeros_like(im2col_ref)
    for bi in range(bblk):
        base = bi * L
        for kk in range(ks):
            off = kk - pad                       # -pad .. +pad
            lo = max(0, -off)                    # first valid output row
            hi = min(L, L - off)                 # one past last valid output row
            if hi > lo:
                im2col_ref[base + lo:base + hi, kk * D:(kk + 1) * D] = \
                    x1_ref[base + lo + off:base + hi + off, :]

    hact = jnp.dot(im2col_ref[...], w1, preferred_element_type=jnp.float32) + b1
    hact = jnp.maximum(hact, 0.0)                                         # ReLU
    y = jnp.dot(hact, w2, preferred_element_type=jnp.float32) + b2        # k=1 conv

    # dropout == identity; residual + LayerNorm for the whole block at once,
    # stored as a single dense (bblk*L, D) tile.
    y_ref[...] = _layernorm(x1_ref[...] + y, g2, bt2)


def _use_batch_parallel_grid() -> bool:
    """Keep batch as a parallel grid axis only on multi-TensorCore chips."""
    try:
        kind = jax.devices()[0].device_kind.lower()
    except Exception:
        return True
    # Single-TC inference chips (v5e / v6e): fold the batch into one grid step
    # to avoid fixed per-grid-step overhead. Multi-TC chips: one element/core.
    if any(tag in kind for tag in ("lite", "v5e", "v6e")):
        return False
    return True


def fft_block_forward(x, params, batch_parallel=None):
    # TODO(synk): key_padding_mask is not supported (None in this demo).
    B, L, D = x.shape
    d_inner = params['w2_t'].shape[0]
    if batch_parallel is None:
        batch_parallel = _use_batch_parallel_grid()
    bblk = 1 if batch_parallel else B
    grid = (B // bblk,)

    x_flat = x.reshape(B * L, D)   # free host-side reshape -> dense kernel tiles

    kernel = functools.partial(fft_block_kernel, n_head=N_HEAD, ks=KS, seq_len=L)
    y_flat, attn = pl.pallas_call(
        kernel,
        out_shape=(jax.ShapeDtypeStruct((B * L, D), jnp.float32),
                   jax.ShapeDtypeStruct((B, L, L), jnp.float32)),
        grid_spec=pltpu.PrefetchScalarGridSpec(
            num_scalar_prefetch=0,
            grid=grid,
            in_specs=[
                pl.BlockSpec((bblk * L, D), lambda b: (b, 0)),        # x (flattened)
                pl.BlockSpec((D, 3 * D), lambda b: (0, 0)),           # w_in_t
                pl.BlockSpec((1, 3 * D), lambda b: (0, 0)),           # b_in
                pl.BlockSpec((D, D), lambda b: (0, 0)),               # w_out_t
                pl.BlockSpec((1, D), lambda b: (0, 0)),               # b_out
                pl.BlockSpec((1, D), lambda b: (0, 0)),               # g1
                pl.BlockSpec((1, D), lambda b: (0, 0)),               # beta1
                pl.BlockSpec((KS * D, d_inner), lambda b: (0, 0)),    # w1 (im2col)
                pl.BlockSpec((1, d_inner), lambda b: (0, 0)),         # b1
                pl.BlockSpec((d_inner, D), lambda b: (0, 0)),         # w2_t
                pl.BlockSpec((1, D), lambda b: (0, 0)),               # b2
                pl.BlockSpec((1, D), lambda b: (0, 0)),               # g2
                pl.BlockSpec((1, D), lambda b: (0, 0)),               # beta2
            ],
            out_specs=(pl.BlockSpec((bblk * L, D), lambda b: (b, 0)),
                       pl.BlockSpec((bblk, L, L), lambda b: (b, 0, 0))),
            scratch_shapes=[
                pltpu.VMEM((bblk * L, D), jnp.float32),               # x1 (post-LN1)
                pltpu.VMEM((bblk * L, KS * D), jnp.float32),          # im2col tile
            ]),
        compiler_params=pltpu.CompilerParams(
            dimension_semantics=(("parallel",) if batch_parallel else ("arbitrary",))),
    )(x_flat, params['w_in_t'], params['b_in'], params['w_out_t'], params['b_out'],
      params['g1'], params['beta1'],
      params['w1_col'], params['b1'], params['w2_t'], params['b2'],
      params['g2'], params['beta2'])
    return y_flat.reshape(B, L, D), attn


def init_params(key):
    D, DI = D_MODEL, D_INNER
    ks = jax.random.split(key, 8)
    w_in = jax.random.normal(ks[0], (3 * D, D), jnp.float32) * 0.05   # in_proj_weight
    b_in = jax.random.normal(ks[1], (3 * D,), jnp.float32) * 0.05     # in_proj_bias
    w_out = jax.random.normal(ks[2], (D, D), jnp.float32) * 0.05      # out_proj.weight
    b_out = jax.random.normal(ks[3], (D,), jnp.float32) * 0.05        # out_proj.bias
    w1 = jax.random.normal(ks[4], (DI, D, KS), jnp.float32) * 0.05    # Conv1d(D, DI, 9)
    b1 = jax.random.normal(ks[5], (DI,), jnp.float32) * 0.05
    w2 = jax.random.normal(ks[6], (D, DI, 1), jnp.float32) * 0.05     # Conv1d(DI, D, 1)
    b2 = jax.random.normal(ks[7], (D,), jnp.float32) * 0.05
    return {
        'w_in_t': jnp.transpose(w_in),                              # (D, 3D)
        'b_in': b_in.reshape(1, 3 * D),
        'w_out_t': jnp.transpose(w_out),                            # (D, D)
        'b_out': b_out.reshape(1, D),
        # k=9 conv taps pre-reshaped for one im2col matmul: (KS, D, DI) -> (KS*D, DI)
        'w1_col': jnp.transpose(w1, (2, 1, 0)).reshape(KS * D, DI),
        'b1': b1.reshape(1, DI),
        'w2_t': jnp.transpose(w2[:, :, 0]),                         # (DI, D)
        'b2': b2.reshape(1, D),
        'g1': jnp.ones((1, D), jnp.float32), 'beta1': jnp.zeros((1, D), jnp.float32),
        'g2': jnp.ones((1, D), jnp.float32), 'beta2': jnp.zeros((1, D), jnp.float32),
    }


def ref_forward(x, p):
    """Pure-JAX reference replicating PyTorch FFTBlock (eval mode, mask=None)."""
    B, L, D = x.shape
    hd = D // N_HEAD
    qkv = x @ p['w_in_t'] + p['b_in'][0]
    q, k, v = qkv[..., :D], qkv[..., D:2 * D], qkv[..., 2 * D:]

    def split(t):
        return t.reshape(B, L, N_HEAD, hd).transpose(0, 2, 1, 3)

    qh, kh, vh = split(q), split(k), split(v)
    sc = jnp.einsum('bhld,bhmd->bhlm', qh, kh) / math.sqrt(hd)
    a = jax.nn.softmax(sc, axis=-1)
    o = jnp.einsum('bhlm,bhmd->bhld', a, vh).transpose(0, 2, 1, 3).reshape(B, L, D)
    o = o @ p['w_out_t'] + p['b_out'][0]

    def ln(t, g, bt):
        mu = t.mean(-1, keepdims=True)
        var = ((t - mu) ** 2).mean(-1, keepdims=True)
        return (t - mu) / jnp.sqrt(var + EPS) * g[0] + bt[0]

    x1 = ln(x + o, p['g1'], p['beta1'])
    xp = jnp.pad(x1, ((0, 0), (PAD, PAD), (0, 0)))
    w1_taps = p['w1_col'].reshape(KS, D, D_INNER)
    h = sum(jnp.einsum('bld,di->bli', xp[:, kk:kk + L, :], w1_taps[kk])
            for kk in range(KS))
    h = jnp.maximum(h + p['b1'][0], 0.0)
    y = h @ p['w2_t'] + p['b2'][0]
    x2 = ln(x1 + y, p['g2'], p['beta2'])
    return x2, a.mean(axis=1)


if __name__ == "__main__":
    key = jax.random.PRNGKey(0)
    kx, kp = jax.random.split(key)
    x = jax.random.normal(kx, (BATCH, SEQ, D_MODEL), jnp.float32)
    params = init_params(kp)

    out, attn = jax.jit(fft_block_forward)(x, params)
    out = jax.block_until_ready(out)
    attn = jax.block_until_ready(attn)

    ref_out, ref_attn = ref_forward(x, params)
    assert out.shape == (BATCH, SEQ, D_MODEL)
    assert attn.shape == (BATCH, SEQ, SEQ)
    assert jnp.max(jnp.abs(out - ref_out)) < 1e-3
    assert jnp.max(jnp.abs(attn - ref_attn)) < 1e-3

    print("KERNEL_OK")
</pallas_src>

<mosaic_0001>
module attributes {stable_mosaic.version = 11 : i64} {
  func.func @fft_block_kernel(%arg0: i32, %arg1: memref<8x32xf32, #tpu.memory_space<vmem>>, %arg2: memref<32x96xf32, #tpu.memory_space<vmem>>, %arg3: memref<1x96xf32, #tpu.memory_space<vmem>>, %arg4: memref<32x32xf32, #tpu.memory_space<vmem>>, %arg5: memref<1x32xf32, #tpu.memory_space<vmem>>, %arg6: memref<1x32xf32, #tpu.memory_space<vmem>>, %arg7: memref<1x32xf32, #tpu.memory_space<vmem>>, %arg8: memref<288x64xf32, #tpu.memory_space<vmem>>, %arg9: memref<1x64xf32, #tpu.memory_space<vmem>>, %arg10: memref<64x32xf32, #tpu.memory_space<vmem>>, %arg11: memref<1x32xf32, #tpu.memory_space<vmem>>, %arg12: memref<1x32xf32, #tpu.memory_space<vmem>>, %arg13: memref<1x32xf32, #tpu.memory_space<vmem>>, %arg14: memref<8x32xf32, #tpu.memory_space<vmem>>, %arg15: memref<1x8x8xf32, #tpu.memory_space<vmem>>, %arg16: memref<8x32xf32, #tpu.memory_space<vmem>>, %arg17: memref<8x288xf32, #tpu.memory_space<vmem>>) attributes {dimension_semantics = [#tpu.dimension_semantics<parallel>], iteration_bounds = array<i64: 2>, scalar_prefetch = 0 : i64, scratch_operands = 2 : i64, tpu.core_type = #tpu.core_type<tc>, window_params = [{transform_indices = @transform_0, window_bounds = array<i64: 8, 32>}, {pipeline_mode = #tpu.pipeline_mode<synchronous>, transform_indices = @transform_1, window_bounds = array<i64: 32, 96>}, {pipeline_mode = #tpu.pipeline_mode<synchronous>, transform_indices = @transform_2, window_bounds = array<i64: 1, 96>}, {pipeline_mode = #tpu.pipeline_mode<synchronous>, transform_indices = @transform_3, window_bounds = array<i64: 32, 32>}, {pipeline_mode = #tpu.pipeline_mode<synchronous>, transform_indices = @transform_4, window_bounds = array<i64: 1, 32>}, {pipeline_mode = #tpu.pipeline_mode<synchronous>, transform_indices = @transform_5, window_bounds = array<i64: 1, 32>}, {pipeline_mode = #tpu.pipeline_mode<synchronous>, transform_indices = @transform_6, window_bounds = array<i64: 1, 32>}, {pipeline_mode = #tpu.pipeline_mode<synchronous>, transform_indices = @transform_7, window_bounds = array<i64: 288, 64>}, {pipeline_mode = #tpu.pipeline_mode<synchronous>, transform_indices = @transform_8, window_bounds = array<i64: 1, 64>}, {pipeline_mode = #tpu.pipeline_mode<synchronous>, transform_indices = @transform_9, window_bounds = array<i64: 64, 32>}, {pipeline_mode = #tpu.pipeline_mode<synchronous>, transform_indices = @transform_10, window_bounds = array<i64: 1, 32>}, {pipeline_mode = #tpu.pipeline_mode<synchronous>, transform_indices = @transform_11, window_bounds = array<i64: 1, 32>}, {pipeline_mode = #tpu.pipeline_mode<synchronous>, transform_indices = @transform_12, window_bounds = array<i64: 1, 32>}, {transform_indices = @transform_13, window_bounds = array<i64: 8, 32>}, {transform_indices = @transform_14, window_bounds = array<i64: 1, 8, 8>}]} {
    %c0 = arith.constant 0 : index
    %c0_0 = arith.constant 0 : index
    %0 = vector.load %arg2[%c0, %c0_0] : memref<32x96xf32, #tpu.memory_space<vmem>>, vector<32x96xf32>
    %c0_1 = arith.constant 0 : index
    %c0_2 = arith.constant 0 : index
    %1 = vector.load %arg3[%c0_1, %c0_2] : memref<1x96xf32, #tpu.memory_space<vmem>>, vector<1x96xf32>
    %c0_3 = arith.constant 0 : index
    %c0_4 = arith.constant 0 : index
    %2 = vector.load %arg4[%c0_3, %c0_4] : memref<32x32xf32, #tpu.memory_space<vmem>>, vector<32x32xf32>
    %c0_5 = arith.constant 0 : index
    %c0_6 = arith.constant 0 : index
    %3 = vector.load %arg5[%c0_5, %c0_6] : memref<1x32xf32, #tpu.memory_space<vmem>>, vector<1x32xf32>
    %c0_7 = arith.constant 0 : index
    %c0_8 = arith.constant 0 : index
    %4 = vector.load %arg6[%c0_7, %c0_8] : memref<1x32xf32, #tpu.memory_space<vmem>>, vector<1x32xf32>
    %c0_9 = arith.constant 0 : index
    %c0_10 = arith.constant 0 : index
    %5 = vector.load %arg7[%c0_9, %c0_10] : memref<1x32xf32, #tpu.memory_space<vmem>>, vector<1x32xf32>
    %c0_11 = arith.constant 0 : index
    %c0_12 = arith.constant 0 : index
    %6 = vector.load %arg8[%c0_11, %c0_12] : memref<288x64xf32, #tpu.memory_space<vmem>>, vector<288x64xf32>
    %c0_13 = arith.constant 0 : index
    %c0_14 = arith.constant 0 : index
    %7 = vector.load %arg9[%c0_13, %c0_14] : memref<1x64xf32, #tpu.memory_space<vmem>>, vector<1x64xf32>
    %c0_15 = arith.constant 0 : index
    %c0_16 = arith.constant 0 : index
    %8 = vector.load %arg10[%c0_15, %c0_16] : memref<64x32xf32, #tpu.memory_space<vmem>>, vector<64x32xf32>
    %c0_17 = arith.constant 0 : index
    %c0_18 = arith.constant 0 : index
    %9 = vector.load %arg11[%c0_17, %c0_18] : memref<1x32xf32, #tpu.memory_space<vmem>>, vector<1x32xf32>
    %c0_19 = arith.constant 0 : index
    %c0_20 = arith.constant 0 : index
    %10 = vector.load %arg12[%c0_19, %c0_20] : memref<1x32xf32, #tpu.memory_space<vmem>>, vector<1x32xf32>
    %c0_21 = arith.constant 0 : index
    %c0_22 = arith.constant 0 : index
    %11 = vector.load %arg13[%c0_21, %c0_22] : memref<1x32xf32, #tpu.memory_space<vmem>>, vector<1x32xf32>
    %c0_23 = arith.constant 0 : index
    %c0_24 = arith.constant 0 : index
    %12 = vector.load %arg1[%c0_23, %c0_24] : memref<8x32xf32, #tpu.memory_space<vmem>>, vector<8x32xf32>
    %cst = arith.constant dense<0.000000e+00> : vector<8x96xf32>
    %13 = tpu.matmul %12, %0, %cst {dimension_numbers = #tpu.dot_dimension_numbers<[1], [0], [0], [1], [0, 0, 1, 1], [], []>} : vector<8x32xf32>, vector<32x96xf32>, vector<8x96xf32> -> vector<8x96xf32>
    %14 = vector.broadcast %1 : vector<1x96xf32> to vector<8x96xf32>
    %15 = arith.addf %13, %14 : vector<8x96xf32>
    %16 = vector.extract_strided_slice %15 {offsets = [0, 0], sizes = [8, 32], strides = [1, 1]} : vector<8x96xf32> to vector<8x32xf32>
    %17 = vector.extract_strided_slice %15 {offsets = [0, 32], sizes = [8, 32], strides = [1, 1]} : vector<8x96xf32> to vector<8x32xf32>
    %18 = vector.extract_strided_slice %15 {offsets = [0, 64], sizes = [8, 32], strides = [1, 1]} : vector<8x96xf32> to vector<8x32xf32>
    %19 = vector.extract_strided_slice %16 {offsets = [0, 0], sizes = [8, 8], strides = [1, 1]} : vector<8x32xf32> to vector<8x8xf32>
    %cst_25 = arith.constant 0.353553385 : f32
    %20 = vector.broadcast %cst_25 : f32 to vector<8x8xf32>
    %21 = arith.mulf %19, %20 : vector<8x8xf32>
    %22 = vector.extract_strided_slice %17 {offsets = [0, 0], sizes = [8, 8], strides = [1, 1]} : vector<8x32xf32> to vector<8x8xf32>
    %23 = vector.extract_strided_slice %18 {offsets = [0, 0], sizes = [8, 8], strides = [1, 1]} : vector<8x32xf32> to vector<8x8xf32>
    %cst_26 = arith.constant dense<0.000000e+00> : vector<8x8xf32>
    %24 = tpu.matmul %21, %22, %cst_26 {dimension_numbers = #tpu.dot_dimension_numbers<[1], [1], [0], [0], [0, 0, 1, 0], [], []>} : vector<8x8xf32>, vector<8x8xf32>, vector<8x8xf32> -> vector<8x8xf32>
    %cst_27 = arith.constant dense<0xFF800000> : vector<8xf32>
    %25 = vector.multi_reduction <maximumf>, %24, %cst_27 [1] : vector<8x8xf32> to vector<8xf32>
    %26 = vector.shape_cast %25 : vector<8xf32> to vector<8x1xf32>
    %27 = vector.broadcast %26 : vector<8x1xf32> to vector<8x8xf32>
    %28 = arith.subf %24, %27 : vector<8x8xf32>
    %29 = math.exp %28 : vector<8x8xf32>
    %cst_28 = arith.constant dense<0.000000e+00> : vector<8xf32>
    %30 = vector.multi_reduction <add>, %29, %cst_28 [1] : vector<8x8xf32> to vector<8xf32>
    %31 = vector.shape_cast %30 : vector<8xf32> to vector<8x1xf32>
    %32 = vector.broadcast %31 : vector<8x1xf32> to vector<8x8xf32>
    %33 = arith.divf %29, %32 : vector<8x8xf32>
    %cst_29 = arith.constant dense<0.000000e+00> : vector<8x8xf32>
    %34 = tpu.matmul %33, %23, %cst_29 {dimension_numbers = #tpu.dot_dimension_numbers<[1], [0], [0], [1], [0, 0, 1, 1], [], []>} : vector<8x8xf32>, vector<8x8xf32>, vector<8x8xf32> -> vector<8x8xf32>
    %35 = vector.extract_strided_slice %2 {offsets = [0, 0], sizes = [8, 32], strides = [1, 1]} : vector<32x32xf32> to vector<8x32xf32>
    %cst_30 = arith.constant dense<0.000000e+00> : vector<8x32xf32>
    %36 = tpu.matmul %34, %35, %cst_30 {dimension_numbers = #tpu.dot_dimension_numbers<[1], [0], [0], [1], [0, 0, 1, 1], [], []>} : vector<8x8xf32>, vector<8x32xf32>, vector<8x32xf32> -> vector<8x32xf32>
    %37 = vector.extract_strided_slice %16 {offsets = [0, 8], sizes = [8, 8], strides = [1, 1]} : vector<8x32xf32> to vector<8x8xf32>
    %cst_31 = arith.constant 0.353553385 : f32
    %38 = vector.broadcast %cst_31 : f32 to vector<8x8xf32>
    %39 = arith.mulf %37, %38 : vector<8x8xf32>
    %40 = vector.extract_strided_slice %17 {offsets = [0, 8], sizes = [8, 8], strides = [1, 1]} : vector<8x32xf32> to vector<8x8xf32>
    %41 = vector.extract_strided_slice %18 {offsets = [0, 8], sizes = [8, 8], strides = [1, 1]} : vector<8x32xf32> to vector<8x8xf32>
    %cst_32 = arith.constant dense<0.000000e+00> : vector<8x8xf32>
    %42 = tpu.matmul %39, %40, %cst_32 {dimension_numbers = #tpu.dot_dimension_numbers<[1], [1], [0], [0], [0, 0, 1, 0], [], []>} : vector<8x8xf32>, vector<8x8xf32>, vector<8x8xf32> -> vector<8x8xf32>
    %cst_33 = arith.constant dense<0xFF800000> : vector<8xf32>
    %43 = vector.multi_reduction <maximumf>, %42, %cst_33 [1] : vector<8x8xf32> to vector<8xf32>
    %44 = vector.shape_cast %43 : vector<8xf32> to vector<8x1xf32>
    %45 = vector.broadcast %44 : vector<8x1xf32> to vector<8x8xf32>
    %46 = arith.subf %42, %45 : vector<8x8xf32>
    %47 = math.exp %46 : vector<8x8xf32>
    %cst_34 = arith.constant dense<0.000000e+00> : vector<8xf32>
    %48 = vector.multi_reduction <add>, %47, %cst_34 [1] : vector<8x8xf32> to vector<8xf32>
    %49 = vector.shape_cast %48 : vector<8xf32> to vector<8x1xf32>
    %50 = vector.broadcast %49 : vector<8x1xf32> to vector<8x8xf32>
    %51 = arith.divf %47, %50 : vector<8x8xf32>
    %cst_35 = arith.constant dense<0.000000e+00> : vector<8x8xf32>
    %52 = tpu.matmul %51, %41, %cst_35 {dimension_numbers = #tpu.dot_dimension_numbers<[1], [0], [0], [1], [0, 0, 1, 1], [], []>} : vector<8x8xf32>, vector<8x8xf32>, vector<8x8xf32> -> vector<8x8xf32>
    %53 = vector.extract_strided_slice %2 {offsets = [8, 0], sizes = [8, 32], strides = [1, 1]} : vector<32x32xf32> to vector<8x32xf32>
    %cst_36 = arith.constant dense<0.000000e+00> : vector<8x32xf32>
    %54 = tpu.matmul %52, %53, %cst_36 {dimension_numbers = #tpu.dot_dimension_numbers<[1], [0], [0], [1], [0, 0, 1, 1], [], []>} : vector<8x8xf32>, vector<8x32xf32>, vector<8x32xf32> -> vector<8x32xf32>
    %55 = arith.addf %36, %54 : vector<8x32xf32>
    %56 = arith.addf %33, %51 : vector<8x8xf32>
    %57 = vector.extract_strided_slice %16 {offsets = [0, 16], sizes = [8, 8], strides = [1, 1]} : vector<8x32xf32> to vector<8x8xf32>
    %cst_37 = arith.constant 0.353553385 : f32
    %58 = vector.broadcast %cst_37 : f32 to vector<8x8xf32>
    %59 = arith.mulf %57, %58 : vector<8x8xf32>
    %60 = vector.extract_strided_slice %17 {offsets = [0, 16], sizes = [8, 8], strides = [1, 1]} : vector<8x32xf32> to vector<8x8xf32>
    %61 = vector.extract_strided_slice %18 {offsets = [0, 16], sizes = [8, 8], strides = [1, 1]} : vector<8x32xf32> to vector<8x8xf32>
    %cst_38 = arith.constant dense<0.000000e+00> : vector<8x8xf32>
    %62 = tpu.matmul %59, %60, %cst_38 {dimension_numbers = #tpu.dot_dimension_numbers<[1], [1], [0], [0], [0, 0, 1, 0], [], []>} : vector<8x8xf32>, vector<8x8xf32>, vector<8x8xf32> -> vector<8x8xf32>
    %cst_39 = arith.constant dense<0xFF800000> : vector<8xf32>
    %63 = vector.multi_reduction <maximumf>, %62, %cst_39 [1] : vector<8x8xf32> to vector<8xf32>
    %64 = vector.shape_cast %63 : vector<8xf32> to vector<8x1xf32>
    %65 = vector.broadcast %64 : vector<8x1xf32> to vector<8x8xf32>
    %66 = arith.subf %62, %65 : vector<8x8xf32>
    %67 = math.exp %66 : vector<8x8xf32>
    %cst_40 = arith.constant dense<0.000000e+00> : vector<8xf32>
    %68 = vector.multi_reduction <add>, %67, %cst_40 [1] : vector<8x8xf32> to vector<8xf32>
    %69 = vector.shape_cast %68 : vector<8xf32> to vector<8x1xf32>
    %70 = vector.broadcast %69 : vector<8x1xf32> to vector<8x8xf32>
    %71 = arith.divf %67, %70 : vector<8x8xf32>
    %cst_41 = arith.constant dense<0.000000e+00> : vector<8x8xf32>
    %72 = tpu.matmul %71, %61, %cst_41 {dimension_numbers = #tpu.dot_dimension_numbers<[1], [0], [0], [1], [0, 0, 1, 1], [], []>} : vector<8x8xf32>, vector<8x8xf32>, vector<8x8xf32> -> vector<8x8xf32>
    %73 = vector.extract_strided_slice %2 {offsets = [16, 0], sizes = [8, 32], strides = [1, 1]} : vector<32x32xf32> to vector<8x32xf32>
    %cst_42 = arith.constant dense<0.000000e+00> : vector<8x32xf32>
    %74 = tpu.matmul %72, %73, %cst_42 {dimension_numbers = #tpu.dot_dimension_numbers<[1], [0], [0], [1], [0, 0, 1, 1], [], []>} : vector<8x8xf32>, vector<8x32xf32>, vector<8x32xf32> -> vector<8x32xf32>
    %75 = arith.addf %55, %74 : vector<8x32xf32>
    %76 = arith.addf %56, %71 : vector<8x8xf32>
    %77 = vector.extract_strided_slice %16 {offsets = [0, 24], sizes = [8, 8], strides = [1, 1]} : vector<8x32xf32> to vector<8x8xf32>
    %cst_43 = arith.constant 0.353553385 : f32
    %78 = vector.broadcast %cst_43 : f32 to vector<8x8xf32>
    %79 = arith.mulf %77, %78 : vector<8x8xf32>
    %80 = vector.extract_strided_slice %17 {offsets = [0, 24], sizes = [8, 8], strides = [1, 1]} : vector<8x32xf32> to vector<8x8xf32>
    %81 = vector.extract_strided_slice %18 {offsets = [0, 24], sizes = [8, 8], strides = [1, 1]} : vector<8x32xf32> to vector<8x8xf32>
    %cst_44 = arith.constant dense<0.000000e+00> : vector<8x8xf32>
    %82 = tpu.matmul %79, %80, %cst_44 {dimension_numbers = #tpu.dot_dimension_numbers<[1], [1], [0], [0], [0, 0, 1, 0], [], []>} : vector<8x8xf32>, vector<8x8xf32>, vector<8x8xf32> -> vector<8x8xf32>
    %cst_45 = arith.constant dense<0xFF800000> : vector<8xf32>
    %83 = vector.multi_reduction <maximumf>, %82, %cst_45 [1] : vector<8x8xf32> to vector<8xf32>
    %84 = vector.shape_cast %83 : vector<8xf32> to vector<8x1xf32>
    %85 = vector.broadcast %84 : vector<8x1xf32> to vector<8x8xf32>
    %86 = arith.subf %82, %85 : vector<8x8xf32>
    %87 = math.exp %86 : vector<8x8xf32>
    %cst_46 = arith.constant dense<0.000000e+00> : vector<8xf32>
    %88 = vector.multi_reduction <add>, %87, %cst_46 [1] : vector<8x8xf32> to vector<8xf32>
    %89 = vector.shape_cast %88 : vector<8xf32> to vector<8x1xf32>
    %90 = vector.broadcast %89 : vector<8x1xf32> to vector<8x8xf32>
    %91 = arith.divf %87, %90 : vector<8x8xf32>
    %cst_47 = arith.constant dense<0.000000e+00> : vector<8x8xf32>
    %92 = tpu.matmul %91, %81, %cst_47 {dimension_numbers = #tpu.dot_dimension_numbers<[1], [0], [0], [1], [0, 0, 1, 1], [], []>} : vector<8x8xf32>, vector<8x8xf32>, vector<8x8xf32> -> vector<8x8xf32>
    %93 = vector.extract_strided_slice %2 {offsets = [24, 0], sizes = [8, 32], strides = [1, 1]} : vector<32x32xf32> to vector<8x32xf32>
    %cst_48 = arith.constant dense<0.000000e+00> : vector<8x32xf32>
    %94 = tpu.matmul %92, %93, %cst_48 {dimension_numbers = #tpu.dot_dimension_numbers<[1], [0], [0], [1], [0, 0, 1, 1], [], []>} : vector<8x8xf32>, vector<8x32xf32>, vector<8x32xf32> -> vector<8x32xf32>
    %95 = arith.addf %75, %94 : vector<8x32xf32>
    %96 = arith.addf %76, %91 : vector<8x8xf32>
    %97 = vector.broadcast %3 : vector<1x32xf32> to vector<8x32xf32>
    %98 = arith.addf %95, %97 : vector<8x32xf32>
    %99 = arith.addf %12, %98 : vector<8x32xf32>
    %cst_49 = arith.constant dense<0.000000e+00> : vector<8xf32>
    %100 = vector.multi_reduction <add>, %99, %cst_49 [1] : vector<8x32xf32> to vector<8xf32>
    %101 = vector.shape_cast %100 : vector<8xf32> to vector<8x1xf32>
    %cst_50 = arith.constant 3.200000e+01 : f32
    %102 = vector.broadcast %cst_50 : f32 to vector<8x1xf32>
    %103 = arith.divf %101, %102 : vector<8x1xf32>
    %104 = vector.broadcast %103 : vector<8x1xf32> to vector<8x32xf32>
    %105 = arith.subf %99, %104 : vector<8x32xf32>
    %106 = arith.mulf %105, %105 : vector<8x32xf32>
    %cst_51 = arith.constant dense<0.000000e+00> : vector<8xf32>
    %107 = vector.multi_reduction <add>, %106, %cst_51 [1] : vector<8x32xf32> to vector<8xf32>
    %108 = vector.shape_cast %107 : vector<8xf32> to vector<8x1xf32>
    %cst_52 = arith.constant 3.200000e+01 : f32
    %109 = vector.broadcast %cst_52 : f32 to vector<8x1xf32>
    %110 = arith.divf %108, %109 : vector<8x1xf32>
    %111 = vector.broadcast %103 : vector<8x1xf32> to vector<8x32xf32>
    %112 = arith.subf %99, %111 : vector<8x32xf32>
    %cst_53 = arith.constant 9.99999974E-6 : f32
    %113 = vector.broadcast %cst_53 : f32 to vector<8x1xf32>
    %114 = arith.addf %110, %113 : vector<8x1xf32>
    %115 = math.rsqrt %114 : vector<8x1xf32>
    %116 = vector.broadcast %115 : vector<8x1xf32> to vector<8x32xf32>
    %117 = arith.mulf %112, %116 : vector<8x32xf32>
    %118 = vector.broadcast %4 : vector<1x32xf32> to vector<8x32xf32>
    %119 = arith.mulf %117, %118 : vector<8x32xf32>
    %120 = vector.broadcast %5 : vector<1x32xf32> to vector<8x32xf32>
    %121 = arith.addf %119, %120 : vector<8x32xf32>
    %c0_54 = arith.constant 0 : index
    %c0_55 = arith.constant 0 : index
    %122 = vector.load %arg16[%c0_54, %c0_55] : memref<8x32xf32, #tpu.memory_space<vmem>>, vector<8x32xf32>
    tpu.vector_store %arg16[%c0_54, %c0_55], %121 {strides = array<i32>} : memref<8x32xf32, #tpu.memory_space<vmem>>, vector<8x32xf32>,
    %cst_56 = arith.constant 2.500000e-01 : f32
    %123 = vector.broadcast %cst_56 : f32 to vector<8x8xf32>
    %124 = arith.mulf %96, %123 : vector<8x8xf32>
    %c0_57 = arith.constant 0 : index
    %c0_58 = arith.constant 0 : index
    %c0_59 = arith.constant 0 : index
    %125 = vector.load %arg15[%c0_57, %c0_58, %c0_59] : memref<1x8x8xf32, #tpu.memory_space<vmem>>, vector<1x8x8xf32>
    %126 = vector.shape_cast %125 : vector<1x8x8xf32> to vector<8x8xf32>
    %127 = vector.shape_cast %124 : vector<8x8xf32> to vector<1x8x8xf32>
    tpu.vector_store %arg15[%c0_57, %c0_58, %c0_59], %127 {strides = array<i32>} : memref<1x8x8xf32, #tpu.memory_space<vmem>>, vector<1x8x8xf32>,
    %cst_60 = arith.constant 0.000000e+00 : f32
    %128 = vector.broadcast %cst_60 : f32 to vector<8x288xf32>
    %c0_61 = arith.constant 0 : index
    %c0_62 = arith.constant 0 : index
    %129 = vector.load %arg17[%c0_61, %c0_62] : memref<8x288xf32, #tpu.memory_space<vmem>>, vector<8x288xf32>
    tpu.vector_store %arg17[%c0_61, %c0_62], %128 {strides = array<i32>} : memref<8x288xf32, #tpu.memory_space<vmem>>, vector<8x288xf32>,
    %c0_63 = arith.constant 0 : index
    %c0_64 = arith.constant 0 : index
    %130 = vector.load %arg16[%c0_63, %c0_64] : memref<8x32xf32, #tpu.memory_space<vmem>>, vector<4x32xf32>
    %c4 = arith.constant 4 : index
    %c0_65 = arith.constant 0 : index
    %131 = vector.load %arg17[%c4, %c0_65] : memref<8x288xf32, #tpu.memory_space<vmem>>, vector<4x32xf32>
    tpu.vector_store %arg17[%c4, %c0_65], %130 {strides = array<i32>} : memref<8x288xf32, #tpu.memory_space<vmem>>, vector<4x32xf32>,
    %c0_66 = arith.constant 0 : index
    %c0_67 = arith.constant 0 : index
    %132 = vector.load %arg16[%c0_66, %c0_67] : memref<8x32xf32, #tpu.memory_space<vmem>>, vector<5x32xf32>
    %c3 = arith.constant 3 : index
    %c32 = arith.constant 32 : index
    %133 = vector.load %arg17[%c3, %c32] : memref<8x288xf32, #tpu.memory_space<vmem>>, vector<5x32xf32>
    tpu.vector_store %arg17[%c3, %c32], %132 {strides = array<i32>} : memref<8x288xf32, #tpu.memory_space<vmem>>, vector<5x32xf32>,
    %c0_68 = arith.constant 0 : index
    %c0_69 = arith.constant 0 : index
    %134 = vector.load %arg16[%c0_68, %c0_69] : memref<8x32xf32, #tpu.memory_space<vmem>>, vector<6x32xf32>
    %c2 = arith.constant 2 : index
    %c64 = arith.constant 64 : index
    %135 = vector.load %arg17[%c2, %c64] : memref<8x288xf32, #tpu.memory_space<vmem>>, vector<6x32xf32>
    tpu.vector_store %arg17[%c2, %c64], %134 {strides = array<i32>} : memref<8x288xf32, #tpu.memory_space<vmem>>, vector<6x32xf32>,
    %c0_70 = arith.constant 0 : index
    %c0_71 = arith.constant 0 : index
    %136 = vector.load %arg16[%c0_70, %c0_71] : memref<8x32xf32, #tpu.memory_space<vmem>>, vector<7x32xf32>
    %c1 = arith.constant 1 : index
    %c96 = arith.constant 96 : index
    %137 = vector.load %arg17[%c1, %c96] : memref<8x288xf32, #tpu.memory_space<vmem>>, vector<7x32xf32>
    tpu.vector_store %arg17[%c1, %c96], %136 {strides = array<i32>} : memref<8x288xf32, #tpu.memory_space<vmem>>, vector<7x32xf32>,
    %c0_72 = arith.constant 0 : index
    %c0_73 = arith.constant 0 : index
    %138 = vector.load %arg16[%c0_72, %c0_73] : memref<8x32xf32, #tpu.memory_space<vmem>>, vector<8x32xf32>
    %c0_74 = arith.constant 0 : index
    %c128 = arith.constant 128 : index
    %139 = vector.load %arg17[%c0_74, %c128] : memref<8x288xf32, #tpu.memory_space<vmem>>, vector<8x32xf32>
    tpu.vector_store %arg17[%c0_74, %c128], %138 {strides = array<i32>} : memref<8x288xf32, #tpu.memory_space<vmem>>, vector<8x32xf32>,
    %c1_75 = arith.constant 1 : index
    %c0_76 = arith.constant 0 : index
    %140 = vector.load %arg16[%c1_75, %c0_76] : memref<8x32xf32, #tpu.memory_space<vmem>>, vector<7x32xf32>
    %c0_77 = arith.constant 0 : index
    %c160 = arith.constant 160 : index
    %141 = vector.load %arg17[%c0_77, %c160] : memref<8x288xf32, #tpu.memory_space<vmem>>, vector<7x32xf32>
    tpu.vector_store %arg17[%c0_77, %c160], %140 {strides = array<i32>} : memref<8x288xf32, #tpu.memory_space<vmem>>, vector<7x32xf32>,
    %c2_78 = arith.constant 2 : index
    %c0_79 = arith.constant 0 : index
    %142 = vector.load %arg16[%c2_78, %c0_79] : memref<8x32xf32, #tpu.memory_space<vmem>>, vector<6x32xf32>
    %c0_80 = arith.constant 0 : index
    %c192 = arith.constant 192 : index
    %143 = vector.load %arg17[%c0_80, %c192] : memref<8x288xf32, #tpu.memory_space<vmem>>, vector<6x32xf32>
    tpu.vector_store %arg17[%c0_80, %c192], %142 {strides = array<i32>} : memref<8x288xf32, #tpu.memory_space<vmem>>, vector<6x32xf32>,
    %c3_81 = arith.constant 3 : index
    %c0_82 = arith.constant 0 : index
    %144 = vector.load %arg16[%c3_81, %c0_82] : memref<8x32xf32, #tpu.memory_space<vmem>>, vector<5x32xf32>
    %c0_83 = arith.constant 0 : index
    %c224 = arith.constant 224 : index
    %145 = vector.load %arg17[%c0_83, %c224] : memref<8x288xf32, #tpu.memory_space<vmem>>, vector<5x32xf32>
    tpu.vector_store %arg17[%c0_83, %c224], %144 {strides = array<i32>} : memref<8x288xf32, #tpu.memory_space<vmem>>, vector<5x32xf32>,
    %c4_84 = arith.constant 4 : index
    %c0_85 = arith.constant 0 : index
    %146 = vector.load %arg16[%c4_84, %c0_85] : memref<8x32xf32, #tpu.memory_space<vmem>>, vector<4x32xf32>
    %c0_86 = arith.constant 0 : index
    %c256 = arith.constant 256 : index
    %147 = vector.load %arg17[%c0_86, %c256] : memref<8x288xf32, #tpu.memory_space<vmem>>, vector<4x32xf32>
    tpu.vector_store %arg17[%c0_86, %c256], %146 {strides = array<i32>} : memref<8x288xf32, #tpu.memory_space<vmem>>, vector<4x32xf32>,
    %c0_87 = arith.constant 0 : index
    %c0_88 = arith.constant 0 : index
    %148 = vector.load %arg17[%c0_87, %c0_88] : memref<8x288xf32, #tpu.memory_space<vmem>>, vector<8x288xf32>
    %cst_89 = arith.constant dense<0.000000e+00> : vector<8x64xf32>
    %149 = tpu.matmul %148, %6, %cst_89 {dimension_numbers = #tpu.dot_dimension_numbers<[1], [0], [0], [1], [0, 0, 1, 1], [], []>} : vector<8x288xf32>, vector<288x64xf32>, vector<8x64xf32> -> vector<8x64xf32>
    %150 = vector.broadcast %7 : vector<1x64xf32> to vector<8x64xf32>
    %151 = arith.addf %149, %150 : vector<8x64xf32>
    %cst_90 = arith.constant 0.000000e+00 : f32
    %152 = vector.broadcast %cst_90 : f32 to vector<8x64xf32>
    %153 = arith.maximumf %151, %152 : vector<8x64xf32>
    %cst_91 = arith.constant dense<0.000000e+00> : vector<8x32xf32>
    %154 = tpu.matmul %153, %8, %cst_91 {dimension_numbers = #tpu.dot_dimension_numbers<[1], [0], [0], [1], [0, 0, 1, 1], [], []>} : vector<8x64xf32>, vector<64x32xf32>, vector<8x32xf32> -> vector<8x32xf32>
    %155 = vector.broadcast %9 : vector<1x32xf32> to vector<8x32xf32>
    %156 = arith.addf %154, %155 : vector<8x32xf32>
    %c0_92 = arith.constant 0 : index
    %c0_93 = arith.constant 0 : index
    %157 = vector.load %arg16[%c0_92, %c0_93] : memref<8x32xf32, #tpu.memory_space<vmem>>, vector<8x32xf32>
    %158 = arith.addf %157, %156 : vector<8x32xf32>
    %cst_94 = arith.constant dense<0.000000e+00> : vector<8xf32>
    %159 = vector.multi_reduction <add>, %158, %cst_94 [1] : vector<8x32xf32> to vector<8xf32>
    %160 = vector.shape_cast %159 : vector<8xf32> to vector<8x1xf32>
    %cst_95 = arith.constant 3.200000e+01 : f32
    %161 = vector.broadcast %cst_95 : f32 to vector<8x1xf32>
    %162 = arith.divf %160, %161 : vector<8x1xf32>
    %163 = vector.broadcast %162 : vector<8x1xf32> to vector<8x32xf32>
    %164 = arith.subf %158, %163 : vector<8x32xf32>
    %165 = arith.mulf %164, %164 : vector<8x32xf32>
    %cst_96 = arith.constant dense<0.000000e+00> : vector<8xf32>
    %166 = vector.multi_reduction <add>, %165, %cst_96 [1] : vector<8x32xf32> to vector<8xf32>
    %167 = vector.shape_cast %166 : vector<8xf32> to vector<8x1xf32>
    %cst_97 = arith.constant 3.200000e+01 : f32
    %168 = vector.broadcast %cst_97 : f32 to vector<8x1xf32>
    %169 = arith.divf %167, %168 : vector<8x1xf32>
    %170 = vector.broadcast %162 : vector<8x1xf32> to vector<8x32xf32>
    %171 = arith.subf %158, %170 : vector<8x32xf32>
    %cst_98 = arith.constant 9.99999974E-6 : f32
    %172 = vector.broadcast %cst_98 : f32 to vector<8x1xf32>
    %173 = arith.addf %169, %172 : vector<8x1xf32>
    %174 = math.rsqrt %173 : vector<8x1xf32>
    %175 = vector.broadcast %174 : vector<8x1xf32> to vector<8x32xf32>
    %176 = arith.mulf %171, %175 : vector<8x32xf32>
    %177 = vector.broadcast %10 : vector<1x32xf32> to vector<8x32xf32>
    %178 = arith.mulf %176, %177 : vector<8x32xf32>
    %179 = vector.broadcast %11 : vector<1x32xf32> to vector<8x32xf32>
    %180 = arith.addf %178, %179 : vector<8x32xf32>
    %c0_99 = arith.constant 0 : index
    %c0_100 = arith.constant 0 : index
    %181 = vector.load %arg14[%c0_99, %c0_100] : memref<8x32xf32, #tpu.memory_space<vmem>>, vector<8x32xf32>
    tpu.vector_store %arg14[%c0_99, %c0_100], %180 {strides = array<i32>} : memref<8x32xf32, #tpu.memory_space<vmem>>, vector<8x32xf32>,
    return
  }
  func.func @transform_0(%arg0: i32) -> (i32, i32) {
    %c0_i32 = arith.constant 0 : i32
    %c0_i32_0 = arith.constant 0 : i32
    return %arg0, %c0_i32 : i32, i32
  }
  func.func @transform_1(%arg0: i32) -> (i32, i32) {
    %c0_i32 = arith.constant 0 : i32
    %c0_i32_0 = arith.constant 0 : i32
    %c0_i32_1 = arith.constant 0 : i32
    return %c0_i32, %c0_i32_0 : i32, i32
  }
  func.func @transform_2(%arg0: i32) -> (i32, i32) {
    %c0_i32 = arith.constant 0 : i32
    %c0_i32_0 = arith.constant 0 : i32
    %c0_i32_1 = arith.constant 0 : i32
    return %c0_i32, %c0_i32_0 : i32, i32
  }
  func.func @transform_3(%arg0: i32) -> (i32, i32) {
    %c0_i32 = arith.constant 0 : i32
    %c0_i32_0 = arith.constant 0 : i32
    %c0_i32_1 = arith.constant 0 : i32
    return %c0_i32, %c0_i32_0 : i32, i32
  }
  func.func @transform_4(%arg0: i32) -> (i32, i32) {
    %c0_i32 = arith.constant 0 : i32
    %c0_i32_0 = arith.constant 0 : i32
    %c0_i32_1 = arith.constant 0 : i32
    return %c0_i32, %c0_i32_0 : i32, i32
  }
  func.func @transform_5(%arg0: i32) -> (i32, i32) {
    %c0_i32 = arith.constant 0 : i32
    %c0_i32_0 = arith.constant 0 : i32
    %c0_i32_1 = arith.constant 0 : i32
    return %c0_i32, %c0_i32_0 : i32, i32
  }
  func.func @transform_6(%arg0: i32) -> (i32, i32) {
    %c0_i32 = arith.constant 0 : i32
    %c0_i32_0 = arith.constant 0 : i32
    %c0_i32_1 = arith.constant 0 : i32
    return %c0_i32, %c0_i32_0 : i32, i32
  }
  func.func @transform_7(%arg0: i32) -> (i32, i32) {
    %c0_i32 = arith.constant 0 : i32
    %c0_i32_0 = arith.constant 0 : i32
    %c0_i32_1 = arith.constant 0 : i32
    return %c0_i32, %c0_i32_0 : i32, i32
  }
  func.func @transform_8(%arg0: i32) -> (i32, i32) {
    %c0_i32 = arith.constant 0 : i32
    %c0_i32_0 = arith.constant 0 : i32
    %c0_i32_1 = arith.constant 0 : i32
    return %c0_i32, %c0_i32_0 : i32, i32
  }
  func.func @transform_9(%arg0: i32) -> (i32, i32) {
    %c0_i32 = arith.constant 0 : i32
    %c0_i32_0 = arith.constant 0 : i32
    %c0_i32_1 = arith.constant 0 : i32
    return %c0_i32, %c0_i32_0 : i32, i32
  }
  func.func @transform_10(%arg0: i32) -> (i32, i32) {
    %c0_i32 = arith.constant 0 : i32
    %c0_i32_0 = arith.constant 0 : i32
    %c0_i32_1 = arith.constant 0 : i32
    return %c0_i32, %c0_i32_0 : i32, i32
  }
  func.func @transform_11(%arg0: i32) -> (i32, i32) {
    %c0_i32 = arith.constant 0 : i32
    %c0_i32_0 = arith.constant 0 : i32
    %c0_i32_1 = arith.constant 0 : i32
    return %c0_i32, %c0_i32_0 : i32, i32
  }
  func.func @transform_12(%arg0: i32) -> (i32, i32) {
    %c0_i32 = arith.constant 0 : i32
    %c0_i32_0 = arith.constant 0 : i32
    %c0_i32_1 = arith.constant 0 : i32
    return %c0_i32, %c0_i32_0 : i32, i32
  }
  func.func @transform_13(%arg0: i32) -> (i32, i32) {
    %c0_i32 = arith.constant 0 : i32
    %c0_i32_0 = arith.constant 0 : i32
    return %arg0, %c0_i32 : i32, i32
  }
  func.func @transform_14(%arg0: i32) -> (i32, i32, i32) {
    %c0_i32 = arith.constant 0 : i32
    %c0_i32_0 = arith.constant 0 : i32
    %c0_i32_1 = arith.constant 0 : i32
    return %arg0, %c0_i32, %c0_i32_0 : i32, i32, i32
  }
}

</mosaic_0001>

<bundles_post_ra>
// kernel: fft_block_forward.1
= control target key start
LH: loop header
LB: loop body
LE: loop exit
PB: predicated region body
PF: predicated region fallthrough
CT: control target
= control target key end

     0   :  { %s2007_s0 = inlined_call_operand.vmem [shape: f32[16,32], index: 0, kind: input, shape index: {}]   ;;  %s2008_s1 = inlined_call_operand.vmem [shape: f32[32,96], index: 1, kind: input, shape index: {}]   ;;  %s2009_s2 = inlined_call_operand.vmem [shape: f32[1,96], index: 2, kind: input, shape index: {}]   ;;  %s2010_s3 = inlined_call_operand.vmem [shape: f32[32,32], index: 3, kind: input, shape index: {}]   ;;  %s2011_s4 = inlined_call_operand.vmem [shape: f32[1,32], index: 4, kind: input, shape index: {}]   ;;  %s2012_s5 = inlined_call_operand.vmem [shape: f32[1,32], index: 5, kind: input, shape index: {}]   ;;  %s2013_s6 = inlined_call_operand.vmem [shape: f32[1,32], index: 6, kind: input, shape index: {}]   ;;  %s2014_s7 = inlined_call_operand.vmem [shape: f32[288,64], index: 7, kind: input, shape index: {}]   ;;  %s2015_s8 = inlined_call_operand.vmem [shape: f32[1,64], index: 8, kind: input, shape index: {}]   ;;  %s2016_s9 = inlined_call_operand.vmem [shape: f32[64,32], index: 9, kind: input, shape index: {}]   ;;  %s2017_s10 = inlined_call_operand.vmem [shape: f32[1,32], index: 10, kind: input, shape index: {}]   ;;  %s2018_s11 = inlined_call_operand.vmem [shape: f32[1,32], index: 11, kind: input, shape index: {}]   ;;  %s2019_s12 = inlined_call_operand.vmem [shape: f32[1,32], index: 12, kind: input, shape index: {}]   ;;  %s2020_s13 = inlined_call_operand.hbm [shape: f32[16,32], index: 13, kind: output, shape index: {0}]   ;;  %s2021_s14 = inlined_call_operand.hbm [shape: f32[2,8,8], index: 14, kind: output, shape index: {1}]  }
   0x1   :  { %2029 = sst [smem:[#allocation14_spill]] %s2007_s0 }
   0x2   :  { %2030 = sst [smem:[#allocation15_spill]] %s2008_s1 }
   0x3   :  { %2031 = sst [smem:[#allocation16_spill]] %s2009_s2 }
   0x4   :  { %2032 = sst [smem:[#allocation17_spill]] %s2010_s3 }
   0x5   :  { %2033 = sst [smem:[#allocation18_spill]] %s2011_s4 }
   0x6   :  { %20 = vsyncpa [#allocation5], 0 }
   0x7   :  { %22 = vsyncpa [#allocation5 + $0x1], 0 }
   0x8   :  { %23 = vsyncpa [#allocation7], 0 }
   0x9   :  { %25 = vsyncpa [#allocation7 + $0x1], 0  ;;  %s1639_s29 = smov 0   ;;  %s1641_s30 = smov 0  }
   0xa   :  { %s1643_s15 = smov 0   ;;  %s1645_s16 = smov 0  }
   0xb LB: > { %2034 = sst [smem:[#allocation10_spill]] %s1544_s15  ;;  %s1660_s17 = sadd.s32 4294967295, %s1548_s16   ;;  %s1548_s16 = sphi %s1645_s16, %s2048_s16   ;;  %s1544_s15 = sphi %s1643_s15, %s2050_s15   ;;  %s1540_s30 = sphi %s1641_s30, %s2052_s30   ;;  %s1536_s29 = sphi %s1639_s29, %s2051_s29  }
   0xc   : > { %s1334_s18 = sadd.s32 4294967294, %s1548_s16   ;;  %s1664_s19 = sadd.s32 1, %s1548_s16  }
   0xd   : > { %2035 = sst [smem:[#allocation11_spill]] %s1664_s19  ;;  %s316_s20 = sadd.s32 1, %s1544_s15 }
   0xe   : > { %s313_s21 = ssub.s32 %s1548_s16, %s1664_s19  ;;  %p326_p0 = scmp.ne.s32.totalorder %s1544_s15, %s1540_s30 }
   0xf   : > { %p314_p1 = scmp.eq.s32.totalorder %s313_s21, 0  ;;  %p327_p2 = scmp.eq.s32.totalorder %s1660_s17, 1 }
  0x10   : > { %p332_p3 = scmp.ne.s32.totalorder %s1540_s30, %s1536_s29  ;;  %p333_p4 = scmp.eq.s32.totalorder %s1334_s18, 1 }
  0x11   : > { %s1675_s22 = scalar_select %p314_p1, %s1544_s15, %s316_s20  }
  0x12   : > { %p1677_p5 = por %p327_p2, %p326_p0  ;;  %p1681_p6 = por %p333_p4, %p332_p3 }
  0x13   : > { %2036 = sst [smem:[#allocation12_spill]] %s1675_s22  ;;  %p1337_p7 = scmp.ge.s32.totalorder %s1548_s16, 1 }
  0x14   : > { %s2038_s24 = scalar_select %p1681_p6, 1, 0 }
  0x15   : > { %p420_p8 = scmp.lt.s32.totalorder %s1548_s16, 3 }
  0x16   : > { %2039 = sst [smem:[#allocation13_spill]] %s2038_s24 }
  0x17   : > { %p421_p9 = pnand %p1337_p7, %p420_p8 }
  0x18   : > { %s2040_s1 = sld [smem:[#allocation15_spill]] (!%p421_p9)  ;;  %p470_p10 = scmp.lt.s32.totalorder (!%p421_p9), %s1660_s17, 1 }
  0x19   : > { %424 = sbr.rel (%p421_p9) target bundleno = 2456 (0x998), region = 72  ;;  %s2041_s0 = sld [smem:[#allocation14_spill]] (!%p421_p9) }
  0x1a   : > { %s2042_s2 = sld [smem:[#allocation16_spill]] (!%p421_p9)  ;;  %s1550_s15 = smov (!%p421_p9), 88  }
  0x1b   : > { %s1551_s22 = smov (!%p421_p9), 96   ;;  %s1552_s19 = smov (!%p421_p9), 120  }
  0x1c   : > { %s1554_s18 = smov (!%p421_p9), 104   ;;  %s1555_s20 = smov (!%p421_p9), 80  }
  0x1d   : > { %s2043_s3 = sld [smem:[#allocation17_spill]] (!%p421_p9)  ;;  %s1556_s26 = smov (!%p421_p9), 56  }
  0x1e   : > { %v477_v0 = vld [vmem:[%s2040_s1 + $0x18] sm:$0xff]  ;;  %v476_v1 = vld [vmem:[%s2040_s1 + $0x10] sm:$0xff]  ;;  %v475_v2 = vld [vmem:[%s2040_s1 + $0x8] sm:$0xff]  ;;  %s471_s21 = scalar_select %p470_p10, %s1660_s17, 1  ;;  %vm538_vm0 = vcmask 261120   ;;  %vm566_vm1 = vcmask 64512  }
  0x1f   : > { %554 = vmatpush.msra.mxu0 %v477_v0  ;;  %v474_v3 = vld [vmem:[%s2040_s1] sm:$0xff]  ;;  %s2027_s27 = smov 64   ;;  %s1558_s28 = smov 112  }
  0x20   : > { %s1340_s25 = sshll.u32 %s471_s21, 3  ;;  %v1424_v5 = vld [vmem:[%s2042_s2] ss:$0 sm:$0xff]  ;;  %s2044_s4 = sld [smem:[#allocation18_spill]] }
  0x21   : > { %555 = vmatpush.msra.mxu0 %v476_v1  ;;  %s473_s24 = scalar_lea.vmem %s2041_s0, %s1340_s25  ;;  %s1474_s2 = scalar_lea.hbm %s2021_s14, 16 }
  0x22   : > { %v1704_v4 = vld [vmem:[%s473_s24] sm:$0xff]  ;;  %s1553_s24 = smov 72  }
  0x23   : > { %556 = vmatpush.msra.mxu0 %v475_v2  ;;  %v479_v9 = vld [vmem:[%s2043_s3] sm:$0xff] }
  0x24   : > { %761 = vmatpush.msra.mxu3 %v479_v9 }
  0x25   : > { %557 = vmatpush.msra.mxu0 %v474_v3 }
  0x26   : > { %1341 = vmatmul.msk.f32.vlgmr.msra.gmra.mxu0 %vm538_vm0, %v1704_v4 }
  0xa3   : > { %v559_v6 = vpop.f32.mrf.mxu0 }
  0xa4   : > { %v1711_v7 = vadd.f32 %v1424_v5, %v559_v6 }
  0xa6   : > { %644 = vrot.lane.b32.xlu2 %v1711_v7, %s1550_s15  ;;  %564 = vrot.lane.b32.xlu0 %v1711_v7, %s1551_s22  ;;  %v562_v8 = vmul.f32 0.35355338, %v1711_v7  ;;  %s1559_s15 = smov 40  }
  0xae   : > { %642 = vrot.lane.b32.xlu2 %v562_v8, %s1552_s19  ;;  %s1560_s19 = smov 48  }
  0xb6   : > { %872 = vrot.lane.b32.xlu2 %v1711_v7, %s1553_s24 }
  0xbe   : > { %870 = vrot.lane.b32.xlu2 %v562_v8, %s1554_s18 }
  0xc6   : > { %769 = vrot.lane.b32.xlu2 %v1711_v7, %s1555_s20  ;;  %s1755_s20 = sand.u32 1, %s1540_s30  }
  0xc7   : > { %s2026_s21 = sshll.u32 %s1755_s20, 3  ;;  %s1213_s18 = scalar_lea.sflag [#allocation7], %s1755_s20 }
  0xc8   : > { %s1763_s25 = scalar_lea.vmem [#allocation6], %s2026_s21  ;;  %s2045_s21 = smov 64  }
  0xc9   : > { %s1239_s0 = sshll.u32 %s1763_s25, 4  ;;  %s1240_s0 = int_to_ptr.vmem [resolvable:$true] %s1239_s0 }
 0x100   : > { %v645_v10 = vpop.permute.xlu2 %644 }
 0x108   : > { %v643_v11 = vpop.permute.xlu2 %642 }
 0x110   : > { %v873_v12 = vpop.permute.xlu2 %872 }
 0x111   : > { %1354 = vmatpush.xpose.msk.msrb.mxu3 %vm566_vm1, %v873_v12 }
 0x118   : > { %v565_v13 = vpop.permute.xlu0 %564  ;;  %v871_v14 = vpop.permute.xlu2 %870 }
 0x119   : > { %1342 = vmatpush.xpose.msk.msrb.mxu0 %vm566_vm1, %v565_v13 }
 0x11c   : > { %1343 = vmatmul.msk.f32.vlgmr.msrb.gmra.mxu0 %vm566_vm1, %v562_v8 }
 0x11d   : > { %1345 = vmatpush.xpose.msk.msra.mxu0 %vm566_vm1, %v645_v10 }
 0x120   : > { %v770_v15 = vpop.permute.xlu2 %769 }
 0x121   : > { %1350 = vmatpush.xpose.msk.msrb.mxu0 %vm566_vm1, %v770_v15 }
 0x124   : > { %1346 = vmatmul.msk.f32.vlgmr.msra.gmra.mxu0 %vm566_vm1, %v643_v11 }
 0x199   : > { %v589_v16 = vpop.f32.mrf.mxu0 }
 0x19a   : > { %v592_v17 = vsel %vm566_vm1, %v589_v16, -inf }
 0x19b   : > { %593 = vmax.xlane.f32.xlu0 %v592_v17 }
 0x1a1   : > { %v667_v18 = vpop.f32.mrf.mxu0 }
 0x1a2   : > { %v670_v19 = vsel %vm566_vm1, %v667_v18, -inf }
 0x1a3   : > { %671 = vmax.xlane.f32.xlu2 %v670_v19 }
 0x1bb   : > { %694 = vrot.lane.b32.xlu2 %v1711_v7, %s1556_s26 }
 0x20e   : > { %v594_v20 = vpop.xlane.xlu0 %593 }
 0x20f   : > { %v595_v21 = vsub.f32 %v589_v16, %v594_v20  ;;  %v480_v16 = vld [vmem:[%s2043_s3 + $0x8] sm:$0xff] }
 0x210   : > { %738 = vmatpush.msra.mxu1 %v480_v16 }
 0x211   : > { %v596_v22 = vmul.f32 1.442695, %v595_v21 }
 0x213   : > { %1432 = vpow2.f32 %v596_v22 }
 0x216   : > { %v672_v32 = vpop.xlane.xlu2 %671 }
 0x217   : > { %v673_v44 = vsub.f32 %v667_v18, %v672_v32 }
 0x219   : > { %v1433_v23 = vpop.eup %1432  ;;  %v674_v47 = vmul.f32 1.442695, %v673_v44 }
 0x21a   : > { %v598_v24 = vsel %vm566_vm1, %v1433_v23, 0.0 }
 0x21b   : > { %599 = vadd.xlane.f32.xlu1 %v598_v24 }
 0x21e   : > { %v695_v39 = vpop.permute.xlu2 %694 }
 0x234   : > { %616 = vrot.lane.b32.xlu1 %v1711_v7, %s2027_s27  ;;  %s1563_s27 = smov 32  }
 0x23c   : > { %767 = vrot.lane.b32.xlu1 %v562_v8, %s1558_s28 }
 0x28e   : > { %v600_v25 = vpop.xlane.xlu1 %599 }
 0x28f   : > { %1434 = vrcp.f32 %v600_v25  ;;  %v612_v31 = vand.u32 2147483648, %v600_v25  ;;  %vm606_vm3 = vweird.f32 %v600_v25  ;;  %v610_v33 = vand.u32 2147483647, %v600_v25 }
 0x290   : > { %1436 = vpow2.f32 %v674_v47 }
 0x291   : > { %v613_v35 = vor.u32 1.1754944e-38, %v612_v31  ;;  %vm611_vm5 = vcmp.eq.f32.partialorder %v610_v33, 8.507059e+37 }
 0x295   : > { %v1435_v26 = vpop.eup %1434 }
 0x296   : > { %v602_v27 = vmul.f32 %v1435_v26, %v600_v25  ;;  %vm607_vm2 = vweird.f32 %v1435_v26  ;;  %v1437_v53 = vpop.eup %1436 }
 0x297   : > { %vm608_vm4 = vmor %vm606_vm3, %vm607_vm2  ;;  %v676_v54 = vsel %vm566_vm1, %v1437_v53, 0.0 }
 0x298   : > { %v603_v28 = vsub.f32 1.0, %v602_v27 }
 0x29a   : > { %v604_v29 = vmul.f32 %v1435_v26, %v603_v28 }
 0x29c   : > { %v605_v30 = vadd.f32 %v1435_v26, %v604_v29 }
 0x29e   : > { %v609_v34 = vsel %vm608_vm4, %v1435_v26, %v605_v30 }
 0x29f   : > { %v614_v36 = vsel %vm611_vm5, %v613_v35, %v609_v34 }
 0x2a0   : > { %v1734_v38 = vmul.f32 %v1433_v23, %v614_v36 }
 0x2a6   : > { %v617_v37 = vpop.permute.xlu1 %616 }
 0x2a7   : > { %637 = vmatpush.msra.mxu2 %v617_v37 }
 0x2a8   : > { %1344 = vmatmul.msk.f32.vlgmr.msra.gmra.mxu2 %vm566_vm1, %v1734_v38 }
 0x2a9   : > { %715 = vmatpush.msrb.mxu2 %v695_v39 }
 0x2ae   : > { %v768_v40 = vpop.permute.xlu1 %767 }
 0x2af   : > { %1351 = vmatmul.msk.f32.vlgmr.msrb.gmra.mxu0 %vm566_vm1, %v768_v40 }
 0x32b   : > { %v639_v41 = vpop.f32.mrf.mxu2 }
 0x32c   : > { %1349 = vmatmul.msk.f32.vlgmr.msra.gmra.mxu3 %vm566_vm1, %v639_v41  ;;  %v792_v42 = vpop.f32.mrf.mxu0 }
 0x32d   : > { %v795_v43 = vsel %vm566_vm1, %v792_v42, -inf }
 0x32e   : > { %796 = vmax.xlane.f32.xlu1 %v795_v43  ;;  %v481_v43 = vld [vmem:[%s2043_s3 + $0x10] sm:$0xff] }
 0x32f   : > { %863 = vmatpush.msrb.mxu1 %v481_v43  ;;  %v512_v43 = vld [vmem:[%s2014_s7 + $0xd0] sm:$0xff] }
 0x334   : > { %1355 = vmatmul.msk.f32.vlgmr.msrb.gmra.mxu3 %vm566_vm1, %v871_v14 }
 0x347   : > { %922 = vrot.lane.b32.xlu1 %v1711_v7, %s1559_s15 }
 0x3a1   : > { %v797_v46 = vpop.xlane.xlu1 %796 }
 0x3a2   : > { %v798_v48 = vsub.f32 %v792_v42, %v797_v46  ;;  %v482_v42 = vld [vmem:[%s2043_s3 + $0x18] sm:$0xff] }
 0x3a4   : > { %v799_v52 = vmul.f32 1.442695, %v798_v48 }
 0x3a6   : > { %1438 = vpow2.f32 %v799_v52 }
 0x3ac   : > { %v1439_v55 = vpop.eup %1438 }
 0x3ad   : > { %v801_v56 = vsel %vm566_vm1, %v1439_v55, 0.0 }
 0x3af   : > { %v1743_v45 = vpop.f32.mrf.mxu3 }
 0x3b7   : > { %v895_v49 = vpop.f32.mrf.mxu3 }
 0x3b8   : > { %v898_v50 = vsel %vm566_vm1, %v895_v49, -inf }
 0x3b9   : > { %899 = vmax.xlane.f32.xlu0 %v898_v50  ;;  %v923_v51 = vpop.permute.xlu1 %922 }
 0x3ba   : > { %943 = vmatpush.msra.mxu0 %v923_v51  ;;  %v1425_v51 = vld [vmem:[%s2044_s4] ss:$0 sm:$0xff] }
 0x3c1   : > { %677 = vadd.xlane.f32.xlu0 %v676_v54 }
 0x3c9   : > { %802 = vadd.xlane.f32.xlu0 %v801_v56 }
 0x42c   : > { %v900_v57 = vpop.xlane.xlu0 %899 }
 0x42d   : > { %v901_v58 = vsub.f32 %v895_v49, %v900_v57  ;;  %v1561_v57 = vmov 32.0  }
 0x42f   : > { %v902_v59 = vmul.f32 1.442695, %v901_v58 }
 0x431   : > { %1440 = vpow2.f32 %v902_v59 }
 0x434   : > { %v678_v60 = vpop.xlane.xlu0 %677 }
 0x435   : > { %1442 = vrcp.f32 %v678_v60  ;;  %v690_v2 = vand.u32 2147483648, %v678_v60  ;;  %v688_v5 = vand.u32 2147483647, %v678_v60  ;;  %vm684_vm7 = vweird.f32 %v678_v60 }
 0x437   : > { %v1441_v61 = vpop.eup %1440  ;;  %v691_v8 = vor.u32 1.1754944e-38, %v690_v2  ;;  %vm689_vm9 = vcmp.eq.f32.partialorder %v688_v5, 8.507059e+37 }
 0x438   : > { %v904_v62 = vsel %vm566_vm1, %v1441_v61, 0.0 }
 0x439   : > { %905 = vadd.xlane.f32.xlu0 %v904_v62 }
 0x43b   : > { %v1443_v63 = vpop.eup %1442 }
 0x43c   : > { %v680_v0 = vmul.f32 %v1443_v63, %v678_v60  ;;  %vm685_vm6 = vweird.f32 %v1443_v63  ;;  %v803_v12 = vpop.xlane.xlu0 %802 }
 0x43d   : > { %vm686_vm8 = vmor %vm684_vm7, %vm685_vm6  ;;  %1444 = vrcp.f32 %v803_v12  ;;  %v815_v20 = vand.u32 2147483648, %v803_v12  ;;  %vm809_vm11 = vweird.f32 %v803_v12  ;;  %v813_v21 = vand.u32 2147483647, %v803_v12 }
 0x43e   : > { %v681_v1 = vsub.f32 1.0, %v680_v0  ;;  %vm1075_vm7 = vcmask 257024  }
 0x43f   : > { %v816_v24 = vor.u32 1.1754944e-38, %v815_v20  ;;  %vm814_vm13 = vcmp.eq.f32.partialorder %v813_v21, 8.507059e+37  ;;  %v1427_v21 = vld [vmem:[%s2013_s6] ss:$0 sm:$0xff] }
 0x440   : > { %v682_v3 = vmul.f32 %v1443_v63, %v681_v1 }
 0x442   : > { %v683_v6 = vadd.f32 %v1443_v63, %v682_v3 }
 0x443   : > { %v1445_v13 = vpop.eup %1444 }
 0x444   : > { %v687_v9 = vsel %vm686_vm8, %v1443_v63, %v683_v6  ;;  %v805_v14 = vmul.f32 %v1445_v13, %v803_v12  ;;  %vm810_vm10 = vweird.f32 %v1445_v13  ;;  %v518_v12 = vld [vmem:[%s2014_s7 + $0x100] sm:$0xff]  ;;  %vm1025_vm8 = vcmask 261124  }
 0x445   : > { %v692_v10 = vsel %vm689_vm9, %v691_v8, %v687_v9  ;;  %vm811_vm12 = vmor %vm809_vm11, %vm810_vm10  ;;  %v521_v8 = vld [vmem:[%s2014_s7 + $0x118] sm:$0xff]  ;;  %v1562_v9 = vmov 0.0   ;;  %vm1058_vm9 = vcmask 522496   ;;  %vm1065_vm10 = vcmask 783872  }
 0x446   : > { %v693_v11 = vmul.f32 %v1437_v53, %v692_v10  ;;  %v806_v15 = vsub.f32 1.0, %v805_v14  ;;  %1020 = vst.msk [vmem:[#allocation3 + $0x10] sm:$0xff] %vm538_vm0, %v1562_v9  ;;  %1138 = vmatpush.msrb.mxu0 %v521_v8  ;;  %v520_v10 = vld [vmem:[%s2014_s7 + $0x110] sm:$0xff]  ;;  %vm1072_vm11 = vcmask 1045248  }
 0x447   : > { %1018 = vst [vmem:[#allocation3] sm:$0xff] %v1562_v9 }
 0x448   : > { %1347 = vmatmul.msk.f32.vlgmr.msrb.gmra.mxu2 %vm566_vm1, %v693_v11  ;;  %v807_v17 = vmul.f32 %v1445_v13, %v806_v15  ;;  %v766_v33 = vadd.f32 %v693_v11, %v1734_v38  ;;  %v519_v11 = vld [vmem:[%s2014_s7 + $0x108] sm:$0xff]  ;;  %1019 = vst [vmem:[#allocation3 + $0x8] sm:$0xff] %v1562_v9  ;;  %1139 = vmatpush.msrb.mxu0 %v520_v10  ;;  %v486_v9 = vld [vmem:[%s2014_s7] sm:$0xff] }
 0x44a   : > { %v808_v19 = vadd.f32 %v1445_v13, %v807_v17  ;;  %1140 = vmatpush.msrb.mxu0 %v519_v11 }
 0x44c   : > { %1141 = vmatpush.msrb.mxu0 %v518_v12 }
 0x44d   : > { %819 = vrot.lane.b32.xlu0 %v1711_v7, %s1560_s19  ;;  %v812_v7 = vsel %vm811_vm12, %v1445_v13, %v808_v19  ;;  %v1426_v19 = vld [vmem:[%s2012_s5] ss:$0 sm:$0xff]  ;;  %vm1033_vm12 = vcmask 523523  }
 0x44e   : > { %v817_v26 = vsel %vm814_vm13, %v816_v24, %v812_v7  ;;  %vm1041_vm13 = vcmask 785922  }
 0x44f   : > { %v818_v31 = vmul.f32 %v1439_v55, %v817_v26 }
 0x451   : > { %v869_v37 = vadd.f32 %v818_v31, %v766_v33  ;;  %v514_v33 = vld [vmem:[%s2014_s7 + $0xe0] sm:$0xff] }
 0x4ac   : > { %v906_v18 = vpop.xlane.xlu0 %905 }
 0x4ad   : > { %1446 = vrcp.f32 %v906_v18  ;;  %v918_v27 = vand.u32 2147483648, %v906_v18  ;;  %v916_v29 = vand.u32 2147483647, %v906_v18  ;;  %vm912_vm15 = vweird.f32 %v906_v18 }
 0x4ae   : > { %1448 = vrcp.f32 %v1561_v57  ;;  %v504_v57 = vld [vmem:[%s2014_s7 + $0x90] sm:$0xff] }
 0x4af   : > { %v919_v32 = vor.u32 1.1754944e-38, %v918_v27  ;;  %vm917_vm3 = vcmp.eq.f32.partialorder %v916_v29, 8.507059e+37  ;;  %v516_v29 = vld [vmem:[%s2014_s7 + $0xf0] sm:$0xff] }
 0x4b3   : > { %v1447_v22 = vpop.eup %1446 }
 0x4b4   : > { %v908_v23 = vmul.f32 %v1447_v22, %v906_v18  ;;  %vm913_vm14 = vweird.f32 %v1447_v22  ;;  %v1449_v58 = vpop.eup %1448 }
 0x4b5   : > { %vm914_vm2 = vmor %vm912_vm15, %vm913_vm14  ;;  %v982_v59 = vmul.f32 32.0, %v1449_v58  ;;  %vm1049_vm14 = vcmask 1048321   ;;  %vm1150_vm15 = vcmask 523264  }
 0x4b6   : > { %v909_v25 = vsub.f32 1.0, %v908_v23 }
 0x4b7   : > { %v983_v60 = vsub.f32 1.0, %v982_v59  ;;  %v503_v59 = vld [vmem:[%s2014_s7 + $0x88] sm:$0xff] }
 0x4b8   : > { %v910_v28 = vmul.f32 %v1447_v22, %v909_v25 }
 0x4ba   : > { %v911_v30 = vadd.f32 %v1447_v22, %v910_v28  ;;  %v517_v28 = vld [vmem:[%s2014_s7 + $0xf8] sm:$0xff] }
 0x4bb   : > { %1106 = vmatpush.msra.mxu3 %v517_v28 }
 0x4bc   : > { %v915_v34 = vsel %vm914_vm2, %v1447_v22, %v911_v30  ;;  %v515_v30 = vld [vmem:[%s2014_s7 + $0xe8] sm:$0xff] }
 0x4bd   : > { %v920_v35 = vsel %vm917_vm3, %v919_v32, %v915_v34  ;;  %1107 = vmatpush.msra.mxu3 %v516_v29 }
 0x4be   : > { %v921_v36 = vmul.f32 %v1441_v61, %v920_v35 }
 0x4bf   : > { %v820_v39 = vpop.permute.xlu0 %819  ;;  %1108 = vmatpush.msra.mxu3 %v515_v30 }
 0x4c0   : > { %840 = vmatpush.msra.mxu2 %v820_v39  ;;  %1356 = vmatmul.msk.f32.vlgmr.msra.gmra.mxu0 %vm566_vm1, %v921_v36  ;;  %v972_v40 = vadd.f32 %v921_v36, %v869_v37 }
 0x4c1   : > { %1352 = vmatmul.msk.f32.vlgmr.msra.gmra.mxu2 %vm566_vm1, %v818_v31  ;;  %1109 = vmatpush.msra.mxu3 %v514_v33 }
 0x4c2   : > { %v1016_v41 = vmul.f32 0.25, %v972_v40  ;;  %966 = vmatpush.msrb.mxu2 %v482_v42  ;;  %v513_v42 = vld [vmem:[%s2014_s7 + $0xd8] sm:$0xff] }
 0x4c3   : > { %1110 = vmatpush.msra.mxu3 %v513_v42 }
 0x4c4   : > { %1017 = vst.msk [vmem:[%s1763_s25] sm:$0xff] %vm566_vm1, %v1016_v41 }
 0x4c5   : > { %1111 = vmatpush.msra.mxu3 %v512_v43 }
 0x4cb   : > { %v717_v38 = vpop.f32.mrf.mxu2 }
 0x4cc   : > { %1348 = vmatmul.msk.f32.vlgmr.msra.gmra.mxu1 %vm566_vm1, %v717_v38 }
 0x53d   : > { %v945_v44 = vpop.f32.mrf.mxu0 }
 0x53e   : > { %1357 = vmatmul.msk.f32.vlgmr.msrb.gmra.mxu2 %vm566_vm1, %v945_v44  ;;  %v511_v44 = vld [vmem:[%s2014_s7 + $0xc8] sm:$0xff] }
 0x53f   : > { %1112 = vmatpush.msra.mxu3 %v511_v44 }
 0x544   : > { %v842_v46 = vpop.f32.mrf.mxu2 }
 0x545   : > { %1353 = vmatmul.msk.f32.vlgmr.msrb.gmra.mxu1 %vm566_vm1, %v842_v46  ;;  %vm986_vm1 = vweird.f32 %v1449_v58  ;;  %v510_v46 = vld [vmem:[%s2014_s7 + $0xc0] sm:$0xff] }
 0x546   : > { %1113 = vmatpush.msra.mxu3 %v510_v46 }
 0x549   : > { %v740_v47 = vpop.f32.mrf.mxu1 }
 0x54a   : > { %v764_v48 = vadd.f32 %v1743_v45, %v740_v47  ;;  %v984_v45 = vmul.f32 %v1449_v58, %v983_v60  ;;  %v509_v47 = vld [vmem:[%s2014_s7 + $0xb8] sm:$0xff]  ;;  %v495_v60 = vld [vmem:[%s2014_s7 + $0x48] sm:$0xff] }
 0x54b   : > { %1114 = vmatpush.msra.mxu3 %v509_v47 }
 0x54c   : > { %v985_v61 = vadd.f32 %v1449_v58, %v984_v45  ;;  %v502_v45 = vld [vmem:[%s2014_s7 + $0x80] sm:$0xff] }
 0x54e   : > { %v1782_v62 = vsel %vm986_vm1, %v1449_v58, %v985_v61  ;;  %v496_v58 = vld [vmem:[%s2014_s7 + $0x50] sm:$0xff]  ;;  %v494_v61 = vld [vmem:[%s2014_s7 + $0x40] sm:$0xff] }
 0x5c1   : > { %v968_v52 = vpop.f32.mrf.mxu2 }
 0x5c2   : > { %v865_v49 = vpop.f32.mrf.mxu1 }
 0x5c3   : > { %v868_v50 = vadd.f32 %v865_v49, %v764_v48  ;;  %v501_v48 = vld [vmem:[%s2014_s7 + $0x78] sm:$0xff]  ;;  %v508_v49 = vld [vmem:[%s2014_s7 + $0xb0] sm:$0xff] }
 0x5c4   : > { %1086 = vmatpush.msra.mxu1 %v501_v48  ;;  %1115 = vmatpush.msra.mxu3 %v508_v49 }
 0x5c5   : > { %v971_v53 = vadd.f32 %v968_v52, %v868_v50  ;;  %v500_v50 = vld [vmem:[%s2014_s7 + $0x70] sm:$0xff]  ;;  %v499_v52 = vld [vmem:[%s2014_s7 + $0x68] sm:$0xff] }
 0x5c6   : > { %1087 = vmatpush.msra.mxu1 %v500_v50 }
 0x5c7   : > { %v976_v54 = vadd.f32 %v1425_v51, %v971_v53  ;;  %v507_v51 = vld [vmem:[%s2014_s7 + $0xa8] sm:$0xff]  ;;  %v506_v53 = vld [vmem:[%s2014_s7 + $0xa0] sm:$0xff] }
 0x5c8   : > { %1116 = vmatpush.msra.mxu3 %v507_v51  ;;  %1088 = vmatpush.msra.mxu1 %v499_v52 }
 0x5c9   : > { %v977_v55 = vadd.f32 %v976_v54, %v1704_v4  ;;  %v498_v54 = vld [vmem:[%s2014_s7 + $0x60] sm:$0xff] }
 0x5ca   : > { %1117 = vmatpush.msra.mxu3 %v506_v53  ;;  %1089 = vmatpush.msra.mxu1 %v498_v54 }
 0x5cb   : > { %v978_v56 = vsel %vm538_vm0, %v977_v55, 0.0 }
 0x5cc   : > { %979 = vadd.xlane.f32.xlu0 %v978_v56  ;;  %v497_v56 = vld [vmem:[%s2014_s7 + $0x58] sm:$0xff] }
 0x5cd   : > { %1090 = vmatpush.msra.mxu1 %v497_v56 }
 0x5cf   : > { %1091 = vmatpush.msra.mxu1 %v496_v58 }
 0x5d1   : > { %1092 = vmatpush.msra.mxu1 %v495_v60 }
 0x5d3   : > { %1093 = vmatpush.msra.mxu1 %v494_v61 }
 0x63f   : > { %v980_v63 = vpop.xlane.xlu0 %979 }
 0x640   : > { %v988_v0 = vmul.f32 %v1782_v62, %v980_v63  ;;  %v493_v63 = vld [vmem:[%s2014_s7 + $0x38] sm:$0xff] }
 0x641   : > { %1094 = vmatpush.msra.mxu1 %v493_v63 }
 0x642   : > { %v989_v1 = vsub.f32 %v977_v55, %v988_v0  ;;  %v505_v55 = vld [vmem:[%s2014_s7 + $0x98] sm:$0xff]  ;;  %v492_v0 = vld [vmem:[%s2014_s7 + $0x30] sm:$0xff] }
 0x643   : > { %1118 = vmatpush.msra.mxu3 %v505_v55  ;;  %1095 = vmatpush.msra.mxu1 %v492_v0 }
 0x644   : > { %v990_v2 = vmul.f32 %v989_v1, %v989_v1 }
 0x645   : > { %1119 = vmatpush.msra.mxu3 %v504_v57 }
 0x646   : > { %v991_v4 = vsel %vm538_vm0, %v990_v2, 0.0 }
 0x647   : > { %992 = vadd.xlane.f32.xlu2 %v991_v4  ;;  %1120 = vmatpush.msra.mxu3 %v503_v59  ;;  %v490_v4 = vld [vmem:[%s2014_s7 + $0x20] sm:$0xff] }
 0x649   : > { %1121 = vmatpush.msra.mxu3 %v502_v45 }
 0x6ba   : > { %v993_v3 = vpop.xlane.xlu2 %992 }
 0x6bb   : > { %v994_v5 = vmul.f32 %v993_v3, %v1782_v62  ;;  %v489_v3 = vld [vmem:[%s2014_s7 + $0x18] sm:$0xff] }
 0x6bd   : > { %v995_v6 = vadd.f32 1e-05, %v994_v5  ;;  %v488_v5 = vld [vmem:[%s2014_s7 + $0x10] sm:$0xff] }
 0x6bf   : > { %1450 = vrsqrt.f32 %v995_v6  ;;  %vm1002_vm5 = vweird.f32 %v995_v6 }
 0x6c5   : > { %v1451_v13 = vpop.eup %1450 }
 0x6c6   : > { %v997_v14 = vmul.f32 %v1451_v13, %v995_v6  ;;  %vm1003_vm4 = vweird.f32 %v1451_v13  ;;  %v487_v6 = vld [vmem:[%s2014_s7 + $0x8] sm:$0xff] }
 0x6c7   : > { %vm1004_vm6 = vmor %vm1002_vm5, %vm1003_vm4 }
 0x6c8   : > { %v998_v15 = vmul.f32 %v1451_v13, %v997_v14 }
 0x6ca   : > { %v999_v16 = vmul.f32 0.5, %v998_v15 }
 0x6cc   : > { %v1000_v17 = vsub.f32 1.5, %v999_v16  ;;  %v530_v16 = vld [vmem:[%s2016_s9 + $0x38] sm:$0xff] }
 0x6cd   : > { %1162 = vmatpush.msra.mxu2 %v530_v16 }
 0x6ce   : > { %v1001_v18 = vmul.f32 %v1451_v13, %v1000_v17  ;;  %v529_v17 = vld [vmem:[%s2016_s9 + $0x30] sm:$0xff] }
 0x6cf   : > { %1163 = vmatpush.msra.mxu2 %v529_v17 }
 0x6d0   : > { %v1005_v20 = vsel %vm1004_vm6, %v1451_v13, %v1001_v18  ;;  %v528_v18 = vld [vmem:[%s2016_s9 + $0x28] sm:$0xff] }
 0x6d1   : > { %v1006_v22 = vmul.f32 %v1005_v20, %v989_v1  ;;  %v491_v1 = vld [vmem:[%s2014_s7 + $0x28] sm:$0xff]  ;;  %1164 = vmatpush.msra.mxu2 %v528_v18  ;;  %v526_v20 = vld [vmem:[%s2016_s9 + $0x18] sm:$0xff] }
 0x6d2   : > { %1096 = vmatpush.msra.mxu1 %v491_v1 }
 0x6d3   : > { %v1010_v7 = vmul.f32 %v1426_v19, %v1006_v22  ;;  %v527_v19 = vld [vmem:[%s2016_s9 + $0x20] sm:$0xff]  ;;  %v524_v22 = vld [vmem:[%s2016_s9 + $0x8] sm:$0xff] }
 0x6d4   : > { %1097 = vmatpush.msra.mxu1 %v490_v4  ;;  %1165 = vmatpush.msra.mxu2 %v527_v19 }
 0x6d5   : > { %v1014_v23 = vadd.f32 %v1427_v21, %v1010_v7  ;;  %v525_v21 = vld [vmem:[%s2016_s9 + $0x10] sm:$0xff]  ;;  %v523_v7 = vld [vmem:[%s2016_s9] sm:$0xff] }
 0x6d6   : > { %1098 = vmatpush.msra.mxu1 %v489_v3  ;;  %1166 = vmatpush.msra.mxu2 %v526_v20 }
 0x6d7   : > { %1015 = vst.msk [vmem:[#allocation2] sm:$0xff] %vm538_vm0, %v1014_v23  ;;  %v1428_v23 = vld [vmem:[%s2015_s8] ss:$0 sm:$0xff] }
 0x6d8   : > { %1099 = vmatpush.msra.mxu1 %v488_v5  ;;  %1167 = vmatpush.msra.mxu2 %v525_v21 }
 0x6da   : > { %1100 = vmatpush.msra.mxu1 %v487_v6  ;;  %1168 = vmatpush.msra.mxu2 %v524_v22 }
 0x6dc   : > { %1101 = vmatpush.msra.mxu1 %v486_v9  ;;  %1169 = vmatpush.msra.mxu2 %v523_v7 }
 0x6de   : > { %v1053_v24 = vld [vmem:[#allocation2 + $0x1] sm:$0x7f] }
 0x6df   : > { %v1043_v25 = vld [vmem:[#allocation2] sm:$0x7f]  ;;  %1055 = vrot.lane.b32.xlu1 %v1053_v24, %s1563_s27 }
 0x6e0   : > { %v1074_v26 = vld [vmem:[#allocation2 + $0x4] sm:$0xf]  ;;  %v1045_v27 = vrot.slane %v1043_v25, 7  ;;  %v1021_v32 = vld [vmem:[#allocation2] sm:$0xf] }
 0x6e1   : > { %1076 = vst.msk [vmem:[#allocation3 + $0x10] sm:$0xf] %vm1075_vm7, %v1074_v26  ;;  %v1817_v31 = vld [vmem:[#allocation2] sm:$0xff]  ;;  %v1023_v34 = vrot.slane %v1021_v32, 4 }
 0x6e2   : > { %1046 = vrot.lane.b32.xlu0 %v1045_v27, %s1551_s22  ;;  %1052 = vst.msk [vmem:[#allocation3 + $0x8] sm:$0xff] %vm538_vm0, %v1817_v31  ;;  %v1060_v36 = vld [vmem:[#allocation2 + $0x2] sm:$0x3f]  ;;  %v1429_v32 = vld [vmem:[%s2017_s10] ss:$0 sm:$0xff] }
 0x6e3   : > { %1026 = vst.msk [vmem:[#allocation3] sm:$0xf0] %vm1025_vm8, %v1023_v34  ;;  %v1067_v37 = vld [vmem:[#allocation2 + $0x3] sm:$0x1f] }
 0x6e4   : > { %v1027_v39 = vld [vmem:[#allocation2] sm:$0x1f] }
 0x6e5   : > { %v1029_v40 = vrot.slane %v1027_v39, 5  ;;  %v1035_v41 = vld [vmem:[#allocation2] sm:$0x3f] }
 0x6e6   : > { %v1037_v38 = vrot.slane %v1035_v41, 6 }
 0x6e7   : > { %1062 = vrot.lane.b32.xlu1 %v1060_v36, %s2045_s21 }
 0x6e8   : > { %v1079_v35 = vld [vmem:[#allocation3 + $0x10] sm:$0xff] }
 0x6e9   : > { %1358 = vmatmul.msk.f32.vlgmr.msrb.gmra.mxu0 %vm538_vm0, %v1079_v35 }
 0x6ef   : > { %1069 = vrot.lane.b32.xlu1 %v1067_v37, %s1551_s22  ;;  %s1362_s22 = sshll.u32 %s1660_s17, 3 }
 0x6f7   : > { %1030 = vrot.lane.b32.xlu1 %v1029_v40, %s1563_s27 }
 0x6ff   : > { %1038 = vrot.lane.b32.xlu1 %v1037_v38, %s2045_s21  ;;  %s1237_s21 = scalar_lea.hbm %s2021_s14, %s1362_s22 }
 0x700   : > { %s1241_s24 = sshll.u32 %s1237_s21, 4  ;;  %s1242_s24 = int_to_ptr.hbm [resolvable:$true] %s1241_s24 }
 0x701   : > { %s1468_s26 = sshra.s32 %s1242_s24, 4  ;;  %s1469_s26 = int_to_ptr.hbm [resolvable:$true] %s1468_s26 }
 0x702   : > { %s1470_s28 = scalar_lea.hbm %s1469_s26, 8  ;;  %p1475_p0 = scmp.lt.s32.totalorder %s1469_s26, %s2021_s14 }
 0x703   : > { %p1471_p11 = scmp.ne.s32.totalorder %s1469_s26, %s1470_s28  ;;  %p1476_p1 = scmp.lt.s32.totalorder %s1474_s2, %s1470_s28 }
 0x705   : > { %p1472_p12 = pnand %p1471_p11, %p1677_p5  ;;  %p1477_p2 = por %p1476_p1, %p1475_p0 }
 0x707   : > { %p1473_p13 = pneg %p1472_p12 }
 0x709   : > { %p1478_p3 = pnand %p1477_p2, %p1473_p13 }
 0x751   : > { %v1056_v2 = vpop.permute.xlu1 %1055 }
 0x752   : > { %1059 = vst.msk [vmem:[#allocation3 + $0x8] sm:$0x7f] %vm1058_vm9, %v1056_v2 }
 0x754   : > { %v1047_v14 = vpop.permute.xlu0 %1046 }
 0x759   : > { %v1063_v8 = vpop.permute.xlu1 %1062 }
 0x75a   : > { %1066 = vst.msk [vmem:[#allocation3 + $0x8] sm:$0x3f] %vm1065_vm10, %v1063_v8 }
 0x761   : > { %v1070_v10 = vpop.permute.xlu1 %1069 }
 0x762   : > { %1073 = vst.msk [vmem:[#allocation3 + $0x8] sm:$0x1f] %vm1072_vm11, %v1070_v10 }
 0x766   : > { %v1143_v28 = vpop.f32.mrf.mxu0 }
 0x769   : > { %v1031_v11 = vpop.permute.xlu1 %1030  ;;  %v1078_v12 = vld [vmem:[#allocation3 + $0x8] sm:$0xff] }
 0x76a   : > { %1034 = vst.msk [vmem:[#allocation3] sm:$0xf8] %vm1033_vm12, %v1031_v11  ;;  %1122 = vmatmul.f32.vlgmr.msra.gmra.mxu3 %v1078_v12 }
 0x771   : > { %v1039_v13 = vpop.permute.xlu1 %1038 }
 0x772   : > { %1042 = vst.msk [vmem:[#allocation3] sm:$0xfc] %vm1041_vm13, %v1039_v13 }
 0x773   : > { %1050 = vst.msk [vmem:[#allocation3] sm:$0xfe] %vm1049_vm14, %v1047_v14 }
 0x77a   : > { %v1077_v15 = vld [vmem:[#allocation3] sm:$0xff] }
 0x77b   : > { %1102 = vmatmul.f32.vlgmr.msra.gmra.mxu1 %v1077_v15 }
 0x7ed   : > { %v1123_v26 = vpop.f32.mrf.mxu3 }
 0x7f8   : > { %v1103_v24 = vpop.f32.mrf.mxu1 }
 0x7f9   : > { %v1104_v25 = vadd.f32 %v1428_v23, %v1103_v24 }
 0x7fb   : > { %v1124_v27 = vadd.f32 %v1123_v26, %v1104_v25 }
 0x7fd   : > { %v1144_v29 = vadd.f32 %v1143_v28, %v1124_v27 }
 0x7ff   : > { %v1146_v30 = vmax.f32 %v1144_v29, 0.0 }
 0x801   : > { %1359 = vmatmul.msk.f32.vlgmr.msra.gmra.mxu2 %vm1150_vm15, %v1146_v30 }
 0x884   : > { %v1171_v33 = vpop.f32.mrf.mxu2 }
 0x885   : > { %v1172_v34 = vadd.f32 %v1429_v32, %v1171_v33 }
 0x887   : > { %v1175_v35 = vadd.f32 %v1172_v34, %v1817_v31 }
 0x889   : > { %v1176_v36 = vsel %vm538_vm0, %v1175_v35, 0.0 }
 0x88a   : > { %1177 = vadd.xlane.f32.xlu2 %v1176_v36 }
 0x8fd   : > { %v1178_v37 = vpop.xlane.xlu2 %1177 }
 0x8fe   : > { %v1179_v39 = vmul.f32 %v1178_v37, %v1782_v62 }
 0x900   : > { %v1180_v40 = vsub.f32 %v1175_v35, %v1179_v39 }
 0x902   : > { %v1181_v41 = vmul.f32 %v1180_v40, %v1180_v40 }
 0x904   : > { %v1182_v38 = vsel %vm538_vm0, %v1181_v41, 0.0 }
 0x905   : > { %1183 = vadd.xlane.f32.xlu1 %v1182_v38 }
 0x906   : > { %1481 = shalt.err (!%p1478_p3)
}
 0x907   : > { %1367 = dma.vmem_to_hbm [thread:$0]  (%p1677_p5), %s1240_s0, 128, %s1242_s24, %s1213_s18   ;;  %v1430_v51 = vld [vmem:[%s2018_s11] ss:$0 sm:$0xff] }
 0x908   : > { %s1223_s25 = scalar_lea.hbm %s2020_s13, %s1362_s22  ;;  %v1431_v53 = vld [vmem:[%s2019_s12] ss:$0 sm:$0xff]  ;;  %s2046_s21 = sshll.u32 %s1755_s20, 3 }
 0x909   : > { %s462_s0 = scalar_lea.vmem [#allocation4], %s2046_s21  ;;  %s1227_s18 = sshll.u32 %s1223_s25, 4  ;;  %s1228_s18 = int_to_ptr.hbm [resolvable:$true] %s1227_s18 }
 0x90a   : > { %s1225_s24 = sshll.u32 %s462_s0, 4  ;;  %s1208_s17 = scalar_lea.sflag [#allocation5], %s1755_s20  ;;  %s1226_s24 = int_to_ptr.vmem [resolvable:$true] %s1225_s24 }
 0x90b   : > { %s1496_s26 = sshra.s32 %s1228_s18, 4  ;;  %s1502_s1 = scalar_lea.hbm %s2020_s13, 16  ;;  %s1497_s26 = int_to_ptr.hbm [resolvable:$true] %s1496_s26 }
 0x90c   : > { %s1498_s22 = scalar_lea.hbm %s1497_s26, 8  ;;  %p1503_p9 = scmp.lt.s32.totalorder %s1497_s26, %s2020_s13 }
 0x90d   : > { %p1499_p4 = scmp.ne.s32.totalorder %s1497_s26, %s1498_s22  ;;  %p1504_p10 = scmp.lt.s32.totalorder %s1502_s1, %s1498_s22 }
 0x90f   : > { %p1500_p7 = pnand %p1499_p4, %p1677_p5  ;;  %p1505_p11 = por %p1504_p10, %p1503_p9 }
 0x911   : > { %p1501_p8 = pneg %p1500_p7 }
 0x913   : > { %p1506_p12 = pnand %p1505_p11, %p1501_p8 }
 0x978   : > { %v1184_v31 = vpop.xlane.xlu1 %1183 }
 0x979   : > { %v1185_v42 = vmul.f32 %v1184_v31, %v1782_v62 }
 0x97b   : > { %v1186_v43 = vadd.f32 1e-05, %v1185_v42 }
 0x97d   : > { %1452 = vrsqrt.f32 %v1186_v43  ;;  %vm1193_vm3 = vweird.f32 %v1186_v43 }
 0x983   : > { %v1453_v44 = vpop.eup %1452 }
 0x984   : > { %v1188_v46 = vmul.f32 %v1453_v44, %v1186_v43  ;;  %vm1194_vm2 = vweird.f32 %v1453_v44 }
 0x985   : > { %vm1195_vm1 = vmor %vm1193_vm3, %vm1194_vm2 }
 0x986   : > { %v1189_v47 = vmul.f32 %v1453_v44, %v1188_v46 }
 0x988   : > { %v1190_v48 = vmul.f32 0.5, %v1189_v47 }
 0x98a   : > { %v1191_v49 = vsub.f32 1.5, %v1190_v48 }
 0x98c   : > { %v1192_v50 = vmul.f32 %v1453_v44, %v1191_v49 }
 0x98e   : > { %v1196_v62 = vsel %vm1195_vm1, %v1453_v44, %v1192_v50 }
 0x98f   : > { %v1197_v52 = vmul.f32 %v1196_v62, %v1180_v40 }
 0x991   : > { %v1201_v54 = vmul.f32 %v1430_v51, %v1197_v52 }
 0x993   : > { %v1205_v55 = vadd.f32 %v1431_v53, %v1201_v54 }
 0x995   : > { %1206 = vst.msk [vmem:[%s462_s0] sm:$0xff] %vm538_vm0, %v1205_v55 }
 0x996   : > { %1509 = shalt.err (!%p1506_p12)
}
 0x997   : > { %1366 = dma.vmem_to_hbm [thread:$0]  (%p1677_p5), %s1226_s24, 128, %s1228_s18, %s1208_s17  }
 0x998 PF: > { %p1377_p13 = scmp.ge.s32.totalorder %s1548_s16, 2  ;;  %s1253_s4 = sand.u32 1, %s1536_s29  }
 0x999   : > { %s1254_s25 = scalar_lea.sflag [#allocation5], %s1253_s4 }
 0x99a   : > { %p1371_p0 = pnand %p1377_p13, %p1681_p6 }
 0x99c   : > { %p1372_p1 = pneg %p1371_p0 }
 0x99e   : > { %1527 = dma.done.wait (%p1372_p1), %s1254_s25, 128  }
 0x99f   : > { %1529 = vsyncadd (%p1372_p1), %s1254_s25, 4294967168  ;;  %s1264_s27 = scalar_lea.sflag [#allocation7], %s1253_s4 }
 0x9a0   : > { %1531 = dma.done.wait (%p1372_p1), %s1264_s27, 128  }
 0x9a1   : > { %1533 = vsyncadd (%p1372_p1), %s1264_s27, 4294967168  ;;  %s2048_s16 = sld [smem:[#allocation11_spill]]  ;;  %s2051_s29 = smov %s1540_s30 }
 0x9a2   : > { %s2049_s19 = sld [smem:[#allocation10_spill]] }
 0x9a3   : > { %s2050_s15 = sld [smem:[#allocation12_spill]] }
 0x9a7   : > { %p28_p5 = scmp.ge.s32.totalorder %s2048_s16, 4  }
 0x9a8   : > { %s2052_s30 = smov %s2049_s19 }
 0x9a9   :  { %30 = sbr.rel (!%p28_p5) target bundleno = 11 (0xb), region = 124 }
 0x9ae   :  { %1270 = vsyncpa [#allocation5], 1 }
 0x9af   :  { %1272 = vsyncpa [#allocation5 + $0x1], 1 }
 0x9b0   :  { %1273 = vsyncpa [#allocation7], 1 }
 0x9b1   :  { %1275 = vsyncpa [#allocation7 + $0x1], 1 }

</bundles_post_ra>
